<compile_context>
chip_gen: v7x
topology: tpu7x:2x2x1
jax: 0.10.0
libtpu: 0.0.40
codegen_flags: <defaults>
</compile_context>

<pallas_src>
import functools

import jax
import jax.numpy as jnp
from jax.experimental import pallas as pl
from jax.experimental.pallas import tpu as pltpu


# ----------------------------------------------------------------------------
# Fused kernel: one batch element per grid step; everything stays in VMEM.
# ----------------------------------------------------------------------------
def _decoder_kernel(x_ref, w1_ref, w2_ref, wt_ref, b1_ref, b2_ref, bt_ref,
                    o_even_ref, o_odd_ref, xp_ref, a1p_ref, a2p_ref,
                    *, compute_dtype):
    H = x_ref.shape[1]
    f32 = jnp.float32

    def mm(a, b):
        return jnp.dot(a.astype(compute_dtype), b.astype(compute_dtype),
                       preferred_element_type=f32)

    zrow_in = jnp.zeros((1, xp_ref.shape[1]), f32)
    zrow_a1 = jnp.zeros((1, a1p_ref.shape[1]), f32)
    zrow_a2 = jnp.zeros((1, a2p_ref.shape[1]), f32)

    # ---- conv1 + ReLU -------------------------------------------------------
    # xp = input row-matrix with one zero row of vertical padding on each side;
    # horizontal padding is baked into the Toeplitz weights.
    xp_ref[0:1, :] = zrow_in
    xp_ref[H + 1:H + 2, :] = zrow_in
    xp_ref[1:H + 1, :] = x_ref[0]
    a1 = (mm(xp_ref[0:H, :], w1_ref[0])
          + mm(xp_ref[1:H + 1, :], w1_ref[1])
          + mm(xp_ref[2:H + 2, :], w1_ref[2])
          + b1_ref[...])
    a1 = jnp.maximum(a1, 0.0)

    # ---- conv2 + ReLU -------------------------------------------------------
    a1p_ref[0:1, :] = zrow_a1
    a1p_ref[H + 1:H + 2, :] = zrow_a1
    a1p_ref[1:H + 1, :] = a1
    a2 = (mm(a1p_ref[0:H, :], w2_ref[0])
          + mm(a1p_ref[1:H + 1, :], w2_ref[1])
          + mm(a1p_ref[2:H + 2, :], w2_ref[2])
          + b2_ref[...])
    a2 = jnp.maximum(a2, 0.0)

    # ---- ConvTranspose2d(k=3, s=2, p=1, output_padding=1) + ReLU ------------
    # Parity decomposition: even output rows depend only on input row p,
    # odd output rows on input rows p and p+1 (zero row below the last one).
    a2p_ref[0:H, :] = a2
    a2p_ref[H:H + 1, :] = zrow_a2
    y_even = jnp.maximum(mm(a2, wt_ref[0]) + bt_ref[...], 0.0)
    y_odd = jnp.maximum(mm(a2, wt_ref[1])
                        + mm(a2p_ref[1:H + 1, :], wt_ref[2])
                        + bt_ref[...], 0.0)

    o_even_ref[0] = y_even.astype(o_even_ref.dtype)
    o_odd_ref[0] = y_odd.astype(o_odd_ref.dtype)


# ----------------------------------------------------------------------------
# Weight packing (pure JAX, runs once per call in the wrapper).
# ----------------------------------------------------------------------------
def _conv_toeplitz(w_oihw, W):
    """Conv2d weight (O,I,3,3) -> stacked block-Toeplitz matrices (3, W*I, W*O).

    Row-matrix convention X[h, w*I + c] = x[h, w, c].  The padded conv becomes
        y[h] = sum_dy Xpad[h + dy] @ T[dy]
    with T[dy][(wi, ci), (wo, co)] = K[dy, wi - wo + 1, ci, co] (zero out of range).
    """
    k_hwio = jnp.transpose(w_oihw, (2, 3, 1, 0))            # (3, 3, I, O)
    cin, cout = k_hwio.shape[2], k_hwio.shape[3]
    wi = jnp.arange(W)[:, None]
    wo = jnp.arange(W)[None, :]
    dx = wi - wo + 1                                        # (W, W)
    valid = (dx >= 0) & (dx <= 2)
    dxc = jnp.clip(dx, 0, 2)

    def one(dy):
        blocks = jnp.where(valid[:, :, None, None], k_hwio[dy][dxc], 0.0)
        return blocks.transpose(0, 2, 1, 3).reshape(W * cin, W * cout)

    return jnp.stack([one(0), one(1), one(2)], axis=0)


def _tconv_phase_toeplitz(wt_iohw, W):
    """ConvTranspose2d weight (I,O,3,3), s=2, p=1, op=1 -> (3, W*I, 2W*O).

    Parity decomposition of the output rows of the transposed conv:
      y[2p]   = A[p] @ T[0]                     (kernel row ky=1)
      y[2p+1] = A[p] @ T[1] + A[p+1] @ T[2]     (kernel rows ky=2 and ky=0)
    Horizontally, input column q feeds output column 2q via kx=1, 2q+1 via kx=2
    and 2q-1 via kx=0 (zero otherwise) — built directly from the raw PyTorch
    IOHW weight, independent of the flip/dilation identity used by the reference.
    """
    ci, co = wt_iohw.shape[0], wt_iohw.shape[1]
    q = jnp.arange(W)[:, None]
    ox = jnp.arange(2 * W)[None, :]
    d = ox - 2 * q                                          # (W, 2W)
    kx = jnp.where(d == 0, 1, jnp.where(d == 1, 2, 0))
    valid = (d >= -1) & (d <= 1)

    def one(ky):
        wk = jnp.transpose(wt_iohw[:, :, ky, :], (2, 0, 1))  # (3, I, O), by kx
        blocks = jnp.where(valid[:, :, None, None], wk[kx], 0.0)
        return blocks.transpose(0, 2, 1, 3).reshape(W * ci, 2 * W * co)

    return jnp.stack([one(1), one(2), one(0)], axis=0)


# ----------------------------------------------------------------------------
# Wrapper
# ----------------------------------------------------------------------------
def decoder_forward(x_nchw, params, *, compute_dtype=jnp.bfloat16):
    """Matches Decoder.forward: NCHW in -> NCHW out, single fused Pallas kernel."""
    N, C2, H, W = x_nchw.shape
    C = C2 // 2
    Ct = C // 2
    wc0, wc1, wct = W * C2, W * C, 2 * W * Ct

    # Layout plumbing + weight packing (tiny XLA work outside the kernel).
    x_rows = jnp.transpose(x_nchw, (0, 2, 3, 1)).reshape(N, H, wc0)
    w1 = _conv_toeplitz(params["w1_oihw"], W).astype(compute_dtype)
    w2 = _conv_toeplitz(params["w2_oihw"], W).astype(compute_dtype)
    wt = _tconv_phase_toeplitz(params["wt_iohw"], W).astype(compute_dtype)
    b1 = jnp.tile(params["b1"], W).reshape(1, wc1).astype(jnp.float32)
    b2 = jnp.tile(params["b2"], W).reshape(1, wc1).astype(jnp.float32)
    bt = jnp.tile(params["bt"], 2 * W).reshape(1, wct).astype(jnp.float32)

    kernel = functools.partial(_decoder_kernel, compute_dtype=compute_dtype)
    y_even, y_odd = pl.pallas_call(
        kernel,
        out_shape=(jax.ShapeDtypeStruct((N, H, wct), jnp.float32),
                   jax.ShapeDtypeStruct((N, H, wct), jnp.float32)),
        grid=(N,),
        in_specs=[
            pl.BlockSpec((1, H, wc0), lambda n: (n, 0, 0)),     # activation rows
            pl.BlockSpec((3, wc0, wc1), lambda n: (0, 0, 0)),   # conv1 Toeplitz
            pl.BlockSpec((3, wc1, wc1), lambda n: (0, 0, 0)),   # conv2 Toeplitz
            pl.BlockSpec((3, wc1, wct), lambda n: (0, 0, 0)),   # convT phase Toeplitz
            pl.BlockSpec((1, wc1), lambda n: (0, 0)),           # bias rows
            pl.BlockSpec((1, wc1), lambda n: (0, 0)),
            pl.BlockSpec((1, wct), lambda n: (0, 0)),
        ],
        out_specs=[
            pl.BlockSpec((1, H, wct), lambda n: (n, 0, 0)),     # even output rows
            pl.BlockSpec((1, H, wct), lambda n: (n, 0, 0)),     # odd output rows
        ],
        scratch_shapes=[
            pltpu.VMEM((H + 2, wc0), jnp.float32),              # padded input
            pltpu.VMEM((H + 2, wc1), jnp.float32),              # padded act1
            pltpu.VMEM((H + 1, wc1), jnp.float32),              # act2 + bottom pad row
        ],
        compiler_params=pltpu.CompilerParams(
            dimension_semantics=("parallel",)),
    )(x_rows, w1, w2, wt, b1, b2, bt)

    # Interleave even/odd rows and return to NCHW (layout plumbing only).
    y_even = y_even.reshape(N, H, 2 * W, Ct)
    y_odd = y_odd.reshape(N, H, 2 * W, Ct)
    y = jnp.stack([y_even, y_odd], axis=2).reshape(N, 2 * H, 2 * W, Ct)
    return jnp.transpose(y, (0, 3, 1, 2))


# ----------------------------------------------------------------------------
# Parameters (native PyTorch layouts) and pure-XLA reference.
# ----------------------------------------------------------------------------
def init_params(key, channels):
    C = channels
    k1, k2, k3, k4, k5, k6 = jax.random.split(key, 6)
    return {
        # Conv2d weight = (out, in, kh, kw); ConvTranspose2d weight = (in, out, kh, kw)
        "w1_oihw": jax.random.normal(k1, (C, 2 * C, 3, 3), jnp.float32) * 0.1,
        "w2_oihw": jax.random.normal(k2, (C, C, 3, 3), jnp.float32) * 0.1,
        "wt_iohw": jax.random.normal(k3, (C, C // 2, 3, 3), jnp.float32) * 0.1,
        "b1": jax.random.normal(k4, (C,), jnp.float32) * 0.05,
        "b2": jax.random.normal(k5, (C,), jnp.float32) * 0.05,
        "bt": jax.random.normal(k6, (C // 2,), jnp.float32) * 0.05,
    }


def decoder_reference(x_nchw, params):
    """Pure-JAX (XLA) reference built directly from the raw PyTorch-layout weights.
    The transposed conv uses the standard flip + fractional-stride identity,
    derived here independently of the kernel's parity/Toeplitz construction."""
    dn = ("NHWC", "HWIO", "NHWC")
    x = jnp.transpose(x_nchw, (0, 2, 3, 1))

    def conv_relu(x, w_hwio, b, padding, lhs_dilation=(1, 1)):
        y = jax.lax.conv_general_dilated(x, w_hwio, (1, 1), padding,
                                         lhs_dilation=lhs_dilation,
                                         dimension_numbers=dn)
        return jnp.maximum(y + b, 0.0)

    w1 = jnp.transpose(params["w1_oihw"], (2, 3, 1, 0))
    w2 = jnp.transpose(params["w2_oihw"], (2, 3, 1, 0))
    # ConvTranspose2d(k=3, s=2, p=1, output_padding=1) == lhs-dilated conv with the
    # spatially flipped kernel, padding (k-1-p, k-1-p+output_padding) = (1, 2).
    wt = jnp.transpose(params["wt_iohw"][:, :, ::-1, ::-1], (2, 3, 0, 1))

    x = conv_relu(x, w1, params["b1"], ((1, 1), (1, 1)))
    x = conv_relu(x, w2, params["b2"], ((1, 1), (1, 1)))
    x = conv_relu(x, wt, params["bt"], ((1, 2), (1, 2)), lhs_dilation=(2, 2))
    return jnp.transpose(x, (0, 3, 1, 2))


if __name__ == "__main__":
    channels = 8
    N, H, W = 2, 16, 16

    key = jax.random.PRNGKey(0)
    kx, kp = jax.random.split(key)
    x = jax.random.normal(kx, (N, 2 * channels, H, W), jnp.float32)  # NCHW
    params = init_params(kp, channels)

    ref = jax.block_until_ready(decoder_reference(x, params))

    # Exact path (f32 MXU operands) — tight check.
    fwd_f32 = jax.jit(functools.partial(decoder_forward, compute_dtype=jnp.float32))
    out = jax.block_until_ready(fwd_f32(x, params))
    assert out.shape == (N, channels // 2, 2 * H, 2 * W), out.shape
    err_f32 = float(jnp.max(jnp.abs(out - ref)))
    assert err_f32 < 1e-3, err_f32

    # Fast path for v6e/v7x (bf16 MXU operands, f32 accumulation + f32 epilogue).
    fwd_bf16 = jax.jit(functools.partial(decoder_forward, compute_dtype=jnp.bfloat16))
    out_bf = jax.block_until_ready(fwd_bf16(x, params))
    err_bf16 = float(jnp.max(jnp.abs(out_bf - ref)))
    assert err_bf16 < 5e-2, err_bf16

    print("KERNEL_OK")
</pallas_src>

<mosaic_0001>
module attributes {stable_mosaic.version = 11 : i64} {
  func.func @_decoder_kernel(%arg0: i32, %arg1: memref<1x16x256xf32, #tpu.memory_space<vmem>>, %arg2: memref<3x256x128xf32, #tpu.memory_space<vmem>>, %arg3: memref<3x128x128xf32, #tpu.memory_space<vmem>>, %arg4: memref<3x128x128xf32, #tpu.memory_space<vmem>>, %arg5: memref<1x128xf32, #tpu.memory_space<vmem>>, %arg6: memref<1x128xf32, #tpu.memory_space<vmem>>, %arg7: memref<1x128xf32, #tpu.memory_space<vmem>>, %arg8: memref<1x16x128xf32, #tpu.memory_space<vmem>>, %arg9: memref<1x16x128xf32, #tpu.memory_space<vmem>>, %arg10: memref<18x256xf32, #tpu.memory_space<vmem>>, %arg11: memref<18x128xf32, #tpu.memory_space<vmem>>, %arg12: memref<17x128xf32, #tpu.memory_space<vmem>>) attributes {dimension_semantics = [#tpu.dimension_semantics<parallel>], iteration_bounds = array<i64: 2>, scalar_prefetch = 0 : i64, scratch_operands = 3 : i64, tpu.core_type = #tpu.core_type<tc>, window_params = [{transform_indices = @transform_0, window_bounds = array<i64: 1, 16, 256>}, {pipeline_mode = #tpu.pipeline_mode<synchronous>, transform_indices = @transform_1, window_bounds = array<i64: 3, 256, 128>}, {pipeline_mode = #tpu.pipeline_mode<synchronous>, transform_indices = @transform_2, window_bounds = array<i64: 3, 128, 128>}, {pipeline_mode = #tpu.pipeline_mode<synchronous>, transform_indices = @transform_3, window_bounds = array<i64: 3, 128, 128>}, {pipeline_mode = #tpu.pipeline_mode<synchronous>, transform_indices = @transform_4, window_bounds = array<i64: 1, 128>}, {pipeline_mode = #tpu.pipeline_mode<synchronous>, transform_indices = @transform_5, window_bounds = array<i64: 1, 128>}, {pipeline_mode = #tpu.pipeline_mode<synchronous>, transform_indices = @transform_6, window_bounds = array<i64: 1, 128>}, {transform_indices = @transform_7, window_bounds = array<i64: 1, 16, 128>}, {transform_indices = @transform_8, window_bounds = array<i64: 1, 16, 128>}]} {
    %cst = arith.constant 0.000000e+00 : f32
    %0 = vector.broadcast %cst : f32 to vector<1x256xf32>
    %cst_0 = arith.constant 0.000000e+00 : f32
    %1 = vector.broadcast %cst_0 : f32 to vector<1x128xf32>
    %cst_1 = arith.constant 0.000000e+00 : f32
    %2 = vector.broadcast %cst_1 : f32 to vector<1x128xf32>
    %c0 = arith.constant 0 : index
    %c0_2 = arith.constant 0 : index
    %3 = vector.load %arg10[%c0, %c0_2] : memref<18x256xf32, #tpu.memory_space<vmem>>, vector<1x256xf32>
    tpu.vector_store %arg10[%c0, %c0_2], %0 {strides = array<i32>} : memref<18x256xf32, #tpu.memory_space<vmem>>, vector<1x256xf32>,
    %c17 = arith.constant 17 : index
    %c0_3 = arith.constant 0 : index
    %4 = vector.load %arg10[%c17, %c0_3] : memref<18x256xf32, #tpu.memory_space<vmem>>, vector<1x256xf32>
    tpu.vector_store %arg10[%c17, %c0_3], %0 {strides = array<i32>} : memref<18x256xf32, #tpu.memory_space<vmem>>, vector<1x256xf32>,
    %c0_4 = arith.constant 0 : index
    %c0_5 = arith.constant 0 : index
    %c0_6 = arith.constant 0 : index
    %5 = vector.load %arg1[%c0_4, %c0_5, %c0_6] : memref<1x16x256xf32, #tpu.memory_space<vmem>>, vector<1x16x256xf32>
    %6 = vector.shape_cast %5 : vector<1x16x256xf32> to vector<16x256xf32>
    %c1 = arith.constant 1 : index
    %c0_7 = arith.constant 0 : index
    %7 = vector.load %arg10[%c1, %c0_7] : memref<18x256xf32, #tpu.memory_space<vmem>>, vector<16x256xf32>
    tpu.vector_store %arg10[%c1, %c0_7], %6 {strides = array<i32>} : memref<18x256xf32, #tpu.memory_space<vmem>>, vector<16x256xf32>,
    %c0_8 = arith.constant 0 : index
    %c0_9 = arith.constant 0 : index
    %8 = vector.load %arg10[%c0_8, %c0_9] : memref<18x256xf32, #tpu.memory_space<vmem>>, vector<16x256xf32>
    %c0_10 = arith.constant 0 : index
    %c0_11 = arith.constant 0 : index
    %c0_12 = arith.constant 0 : index
    %9 = vector.load %arg2[%c0_10, %c0_11, %c0_12] : memref<3x256x128xf32, #tpu.memory_space<vmem>>, vector<1x256x128xf32>
    %10 = vector.shape_cast %9 : vector<1x256x128xf32> to vector<256x128xf32>
    %cst_13 = arith.constant dense<0.000000e+00> : vector<16x128xf32>
    %11 = tpu.matmul %8, %10, %cst_13 {dimension_numbers = #tpu.dot_dimension_numbers<[1], [0], [0], [1], [0, 0, 1, 1], [], []>} : vector<16x256xf32>, vector<256x128xf32>, vector<16x128xf32> -> vector<16x128xf32>
    %c1_14 = arith.constant 1 : index
    %c0_15 = arith.constant 0 : index
    %12 = vector.load %arg10[%c1_14, %c0_15] : memref<18x256xf32, #tpu.memory_space<vmem>>, vector<16x256xf32>
    %c1_16 = arith.constant 1 : index
    %c0_17 = arith.constant 0 : index
    %c0_18 = arith.constant 0 : index
    %13 = vector.load %arg2[%c1_16, %c0_17, %c0_18] : memref<3x256x128xf32, #tpu.memory_space<vmem>>, vector<1x256x128xf32>
    %14 = vector.shape_cast %13 : vector<1x256x128xf32> to vector<256x128xf32>
    %cst_19 = arith.constant dense<0.000000e+00> : vector<16x128xf32>
    %15 = tpu.matmul %12, %14, %cst_19 {dimension_numbers = #tpu.dot_dimension_numbers<[1], [0], [0], [1], [0, 0, 1, 1], [], []>} : vector<16x256xf32>, vector<256x128xf32>, vector<16x128xf32> -> vector<16x128xf32>
    %16 = arith.addf %11, %15 : vector<16x128xf32>
    %c2 = arith.constant 2 : index
    %c0_20 = arith.constant 0 : index
    %17 = vector.load %arg10[%c2, %c0_20] : memref<18x256xf32, #tpu.memory_space<vmem>>, vector<16x256xf32>
    %c2_21 = arith.constant 2 : index
    %c0_22 = arith.constant 0 : index
    %c0_23 = arith.constant 0 : index
    %18 = vector.load %arg2[%c2_21, %c0_22, %c0_23] : memref<3x256x128xf32, #tpu.memory_space<vmem>>, vector<1x256x128xf32>
    %19 = vector.shape_cast %18 : vector<1x256x128xf32> to vector<256x128xf32>
    %cst_24 = arith.constant dense<0.000000e+00> : vector<16x128xf32>
    %20 = tpu.matmul %17, %19, %cst_24 {dimension_numbers = #tpu.dot_dimension_numbers<[1], [0], [0], [1], [0, 0, 1, 1], [], []>} : vector<16x256xf32>, vector<256x128xf32>, vector<16x128xf32> -> vector<16x128xf32>
    %21 = arith.addf %16, %20 : vector<16x128xf32>
    %c0_25 = arith.constant 0 : index
    %c0_26 = arith.constant 0 : index
    %22 = vector.load %arg5[%c0_25, %c0_26] : memref<1x128xf32, #tpu.memory_space<vmem>>, vector<1x128xf32>
    %23 = vector.broadcast %22 : vector<1x128xf32> to vector<16x128xf32>
    %24 = arith.addf %21, %23 : vector<16x128xf32>
    %cst_27 = arith.constant 0.000000e+00 : f32
    %25 = vector.broadcast %cst_27 : f32 to vector<16x128xf32>
    %26 = arith.maximumf %24, %25 : vector<16x128xf32>
    %c0_28 = arith.constant 0 : index
    %c0_29 = arith.constant 0 : index
    %27 = vector.load %arg11[%c0_28, %c0_29] : memref<18x128xf32, #tpu.memory_space<vmem>>, vector<1x128xf32>
    tpu.vector_store %arg11[%c0_28, %c0_29], %1 {strides = array<i32>} : memref<18x128xf32, #tpu.memory_space<vmem>>, vector<1x128xf32>,
    %c17_30 = arith.constant 17 : index
    %c0_31 = arith.constant 0 : index
    %28 = vector.load %arg11[%c17_30, %c0_31] : memref<18x128xf32, #tpu.memory_space<vmem>>, vector<1x128xf32>
    tpu.vector_store %arg11[%c17_30, %c0_31], %1 {strides = array<i32>} : memref<18x128xf32, #tpu.memory_space<vmem>>, vector<1x128xf32>,
    %c1_32 = arith.constant 1 : index
    %c0_33 = arith.constant 0 : index
    %29 = vector.load %arg11[%c1_32, %c0_33] : memref<18x128xf32, #tpu.memory_space<vmem>>, vector<16x128xf32>
    tpu.vector_store %arg11[%c1_32, %c0_33], %26 {strides = array<i32>} : memref<18x128xf32, #tpu.memory_space<vmem>>, vector<16x128xf32>,
    %c0_34 = arith.constant 0 : index
    %c0_35 = arith.constant 0 : index
    %30 = vector.load %arg11[%c0_34, %c0_35] : memref<18x128xf32, #tpu.memory_space<vmem>>, vector<16x128xf32>
    %c0_36 = arith.constant 0 : index
    %c0_37 = arith.constant 0 : index
    %c0_38 = arith.constant 0 : index
    %31 = vector.load %arg3[%c0_36, %c0_37, %c0_38] : memref<3x128x128xf32, #tpu.memory_space<vmem>>, vector<1x128x128xf32>
    %32 = vector.shape_cast %31 : vector<1x128x128xf32> to vector<128x128xf32>
    %cst_39 = arith.constant dense<0.000000e+00> : vector<16x128xf32>
    %33 = tpu.matmul %30, %32, %cst_39 {dimension_numbers = #tpu.dot_dimension_numbers<[1], [0], [0], [1], [0, 0, 1, 1], [], []>} : vector<16x128xf32>, vector<128x128xf32>, vector<16x128xf32> -> vector<16x128xf32>
    %c1_40 = arith.constant 1 : index
    %c0_41 = arith.constant 0 : index
    %34 = vector.load %arg11[%c1_40, %c0_41] : memref<18x128xf32, #tpu.memory_space<vmem>>, vector<16x128xf32>
    %c1_42 = arith.constant 1 : index
    %c0_43 = arith.constant 0 : index
    %c0_44 = arith.constant 0 : index
    %35 = vector.load %arg3[%c1_42, %c0_43, %c0_44] : memref<3x128x128xf32, #tpu.memory_space<vmem>>, vector<1x128x128xf32>
    %36 = vector.shape_cast %35 : vector<1x128x128xf32> to vector<128x128xf32>
    %cst_45 = arith.constant dense<0.000000e+00> : vector<16x128xf32>
    %37 = tpu.matmul %34, %36, %cst_45 {dimension_numbers = #tpu.dot_dimension_numbers<[1], [0], [0], [1], [0, 0, 1, 1], [], []>} : vector<16x128xf32>, vector<128x128xf32>, vector<16x128xf32> -> vector<16x128xf32>
    %38 = arith.addf %33, %37 : vector<16x128xf32>
    %c2_46 = arith.constant 2 : index
    %c0_47 = arith.constant 0 : index
    %39 = vector.load %arg11[%c2_46, %c0_47] : memref<18x128xf32, #tpu.memory_space<vmem>>, vector<16x128xf32>
    %c2_48 = arith.constant 2 : index
    %c0_49 = arith.constant 0 : index
    %c0_50 = arith.constant 0 : index
    %40 = vector.load %arg3[%c2_48, %c0_49, %c0_50] : memref<3x128x128xf32, #tpu.memory_space<vmem>>, vector<1x128x128xf32>
    %41 = vector.shape_cast %40 : vector<1x128x128xf32> to vector<128x128xf32>
    %cst_51 = arith.constant dense<0.000000e+00> : vector<16x128xf32>
    %42 = tpu.matmul %39, %41, %cst_51 {dimension_numbers = #tpu.dot_dimension_numbers<[1], [0], [0], [1], [0, 0, 1, 1], [], []>} : vector<16x128xf32>, vector<128x128xf32>, vector<16x128xf32> -> vector<16x128xf32>
    %43 = arith.addf %38, %42 : vector<16x128xf32>
    %c0_52 = arith.constant 0 : index
    %c0_53 = arith.constant 0 : index
    %44 = vector.load %arg6[%c0_52, %c0_53] : memref<1x128xf32, #tpu.memory_space<vmem>>, vector<1x128xf32>
    %45 = vector.broadcast %44 : vector<1x128xf32> to vector<16x128xf32>
    %46 = arith.addf %43, %45 : vector<16x128xf32>
    %cst_54 = arith.constant 0.000000e+00 : f32
    %47 = vector.broadcast %cst_54 : f32 to vector<16x128xf32>
    %48 = arith.maximumf %46, %47 : vector<16x128xf32>
    %c0_55 = arith.constant 0 : index
    %c0_56 = arith.constant 0 : index
    %49 = vector.load %arg12[%c0_55, %c0_56] : memref<17x128xf32, #tpu.memory_space<vmem>>, vector<16x128xf32>
    tpu.vector_store %arg12[%c0_55, %c0_56], %48 {strides = array<i32>} : memref<17x128xf32, #tpu.memory_space<vmem>>, vector<16x128xf32>,
    %c16 = arith.constant 16 : index
    %c0_57 = arith.constant 0 : index
    %50 = vector.load %arg12[%c16, %c0_57] : memref<17x128xf32, #tpu.memory_space<vmem>>, vector<1x128xf32>
    tpu.vector_store %arg12[%c16, %c0_57], %2 {strides = array<i32>} : memref<17x128xf32, #tpu.memory_space<vmem>>, vector<1x128xf32>,
    %c0_58 = arith.constant 0 : index
    %c0_59 = arith.constant 0 : index
    %c0_60 = arith.constant 0 : index
    %51 = vector.load %arg4[%c0_58, %c0_59, %c0_60] : memref<3x128x128xf32, #tpu.memory_space<vmem>>, vector<1x128x128xf32>
    %52 = vector.shape_cast %51 : vector<1x128x128xf32> to vector<128x128xf32>
    %cst_61 = arith.constant dense<0.000000e+00> : vector<16x128xf32>
    %53 = tpu.matmul %48, %52, %cst_61 {dimension_numbers = #tpu.dot_dimension_numbers<[1], [0], [0], [1], [0, 0, 1, 1], [], []>} : vector<16x128xf32>, vector<128x128xf32>, vector<16x128xf32> -> vector<16x128xf32>
    %c0_62 = arith.constant 0 : index
    %c0_63 = arith.constant 0 : index
    %54 = vector.load %arg7[%c0_62, %c0_63] : memref<1x128xf32, #tpu.memory_space<vmem>>, vector<1x128xf32>
    %55 = vector.broadcast %54 : vector<1x128xf32> to vector<16x128xf32>
    %56 = arith.addf %53, %55 : vector<16x128xf32>
    %cst_64 = arith.constant 0.000000e+00 : f32
    %57 = vector.broadcast %cst_64 : f32 to vector<16x128xf32>
    %58 = arith.maximumf %56, %57 : vector<16x128xf32>
    %c1_65 = arith.constant 1 : index
    %c0_66 = arith.constant 0 : index
    %c0_67 = arith.constant 0 : index
    %59 = vector.load %arg4[%c1_65, %c0_66, %c0_67] : memref<3x128x128xf32, #tpu.memory_space<vmem>>, vector<1x128x128xf32>
    %60 = vector.shape_cast %59 : vector<1x128x128xf32> to vector<128x128xf32>
    %cst_68 = arith.constant dense<0.000000e+00> : vector<16x128xf32>
    %61 = tpu.matmul %48, %60, %cst_68 {dimension_numbers = #tpu.dot_dimension_numbers<[1], [0], [0], [1], [0, 0, 1, 1], [], []>} : vector<16x128xf32>, vector<128x128xf32>, vector<16x128xf32> -> vector<16x128xf32>
    %c1_69 = arith.constant 1 : index
    %c0_70 = arith.constant 0 : index
    %62 = vector.load %arg12[%c1_69, %c0_70] : memref<17x128xf32, #tpu.memory_space<vmem>>, vector<16x128xf32>
    %c2_71 = arith.constant 2 : index
    %c0_72 = arith.constant 0 : index
    %c0_73 = arith.constant 0 : index
    %63 = vector.load %arg4[%c2_71, %c0_72, %c0_73] : memref<3x128x128xf32, #tpu.memory_space<vmem>>, vector<1x128x128xf32>
    %64 = vector.shape_cast %63 : vector<1x128x128xf32> to vector<128x128xf32>
    %cst_74 = arith.constant dense<0.000000e+00> : vector<16x128xf32>
    %65 = tpu.matmul %62, %64, %cst_74 {dimension_numbers = #tpu.dot_dimension_numbers<[1], [0], [0], [1], [0, 0, 1, 1], [], []>} : vector<16x128xf32>, vector<128x128xf32>, vector<16x128xf32> -> vector<16x128xf32>
    %66 = arith.addf %61, %65 : vector<16x128xf32>
    %c0_75 = arith.constant 0 : index
    %c0_76 = arith.constant 0 : index
    %67 = vector.load %arg7[%c0_75, %c0_76] : memref<1x128xf32, #tpu.memory_space<vmem>>, vector<1x128xf32>
    %68 = vector.broadcast %67 : vector<1x128xf32> to vector<16x128xf32>
    %69 = arith.addf %66, %68 : vector<16x128xf32>
    %cst_77 = arith.constant 0.000000e+00 : f32
    %70 = vector.broadcast %cst_77 : f32 to vector<16x128xf32>
    %71 = arith.maximumf %69, %70 : vector<16x128xf32>
    %c0_78 = arith.constant 0 : index
    %c0_79 = arith.constant 0 : index
    %c0_80 = arith.constant 0 : index
    %72 = vector.load %arg8[%c0_78, %c0_79, %c0_80] : memref<1x16x128xf32, #tpu.memory_space<vmem>>, vector<1x16x128xf32>
    %73 = vector.shape_cast %72 : vector<1x16x128xf32> to vector<16x128xf32>
    %74 = vector.shape_cast %58 : vector<16x128xf32> to vector<1x16x128xf32>
    tpu.vector_store %arg8[%c0_78, %c0_79, %c0_80], %74 {strides = array<i32>} : memref<1x16x128xf32, #tpu.memory_space<vmem>>, vector<1x16x128xf32>,
    %c0_81 = arith.constant 0 : index
    %c0_82 = arith.constant 0 : index
    %c0_83 = arith.constant 0 : index
    %75 = vector.load %arg9[%c0_81, %c0_82, %c0_83] : memref<1x16x128xf32, #tpu.memory_space<vmem>>, vector<1x16x128xf32>
    %76 = vector.shape_cast %75 : vector<1x16x128xf32> to vector<16x128xf32>
    %77 = vector.shape_cast %71 : vector<16x128xf32> to vector<1x16x128xf32>
    tpu.vector_store %arg9[%c0_81, %c0_82, %c0_83], %77 {strides = array<i32>} : memref<1x16x128xf32, #tpu.memory_space<vmem>>, vector<1x16x128xf32>,
    return
  }
  func.func @transform_0(%arg0: i32) -> (i32, i32, i32) {
    %c0_i32 = arith.constant 0 : i32
    %c0_i32_0 = arith.constant 0 : i32
    %c0_i32_1 = arith.constant 0 : i32
    return %arg0, %c0_i32, %c0_i32_0 : i32, i32, i32
  }
  func.func @transform_1(%arg0: i32) -> (i32, i32, i32) {
    %c0_i32 = arith.constant 0 : i32
    %c0_i32_0 = arith.constant 0 : i32
    %c0_i32_1 = arith.constant 0 : i32
    %c0_i32_2 = arith.constant 0 : i32
    return %c0_i32, %c0_i32_0, %c0_i32_1 : i32, i32, i32
  }
  func.func @transform_2(%arg0: i32) -> (i32, i32, i32) {
    %c0_i32 = arith.constant 0 : i32
    %c0_i32_0 = arith.constant 0 : i32
    %c0_i32_1 = arith.constant 0 : i32
    %c0_i32_2 = arith.constant 0 : i32
    return %c0_i32, %c0_i32_0, %c0_i32_1 : i32, i32, i32
  }
  func.func @transform_3(%arg0: i32) -> (i32, i32, i32) {
    %c0_i32 = arith.constant 0 : i32
    %c0_i32_0 = arith.constant 0 : i32
    %c0_i32_1 = arith.constant 0 : i32
    %c0_i32_2 = arith.constant 0 : i32
    return %c0_i32, %c0_i32_0, %c0_i32_1 : i32, i32, i32
  }
  func.func @transform_4(%arg0: i32) -> (i32, i32) {
    %c0_i32 = arith.constant 0 : i32
    %c0_i32_0 = arith.constant 0 : i32
    %c0_i32_1 = arith.constant 0 : i32
    return %c0_i32, %c0_i32_0 : i32, i32
  }
  func.func @transform_5(%arg0: i32) -> (i32, i32) {
    %c0_i32 = arith.constant 0 : i32
    %c0_i32_0 = arith.constant 0 : i32
    %c0_i32_1 = arith.constant 0 : i32
    return %c0_i32, %c0_i32_0 : i32, i32
  }
  func.func @transform_6(%arg0: i32) -> (i32, i32) {
    %c0_i32 = arith.constant 0 : i32
    %c0_i32_0 = arith.constant 0 : i32
    %c0_i32_1 = arith.constant 0 : i32
    return %c0_i32, %c0_i32_0 : i32, i32
  }
  func.func @transform_7(%arg0: i32) -> (i32, i32, i32) {
    %c0_i32 = arith.constant 0 : i32
    %c0_i32_0 = arith.constant 0 : i32
    %c0_i32_1 = arith.constant 0 : i32
    return %arg0, %c0_i32, %c0_i32_0 : i32, i32, i32
  }
  func.func @transform_8(%arg0: i32) -> (i32, i32, i32) {
    %c0_i32 = arith.constant 0 : i32
    %c0_i32_0 = arith.constant 0 : i32
    %c0_i32_1 = arith.constant 0 : i32
    return %arg0, %c0_i32, %c0_i32_0 : i32, i32, i32
  }
}

</mosaic_0001>

<bundles_post_ra>
// kernel: tile.28
= control target key start
LH: loop header
LB: loop body
LE: loop exit
PB: predicated region body
PF: predicated region fallthrough
CT: control target
= control target key end

     0   :  { %s40_s0 = inlined_call_operand.vmem [shape: f32[4], index: 0, kind: input, shape index: {}]   ;;  %s41_s1 = inlined_call_operand.vmem [shape: f32[32,4], index: 1, kind: output, shape index: {}]  }
   0x1   :  { %v4_v0 = vld [vmem:[%s40_s0] ss:$0 sm:$0xff] }
   0x2   :  { %5 = vst [vmem:[%s41_s1] sm:$0xff] %v4_v0  ;;  %12 = vst [vmem:[%s41_s1 + $0x8] sm:$0xff] %v4_v0 }
   0x3   :  { %13 = vst [vmem:[%s41_s1 + $0x10] sm:$0xff] %v4_v0  ;;  %14 = vst [vmem:[%s41_s1 + $0x18] sm:$0xff] %v4_v0 }

// kernel: tile.29
= control target key start
LH: loop header
LB: loop body
LE: loop exit
PB: predicated region body
PF: predicated region fallthrough
CT: control target
= control target key end

     0   :  { %s259_s10 = smov 124   ;;  %s260_s11 = smov 116   ;;  %vm3_vm0 = vcmask 31744   ;;  %vm9_vm1 = vcmask 1048544   ;;  %vm15_vm2 = vcmask 1015744   ;;  %vm21_vm3 = vcmask 982944   ;;  %s399_s0 = inlined_call_operand.vmem [shape: f32[32,4], index: 0, kind: input, shape index: {}]   ;;  %s400_s1 = inlined_call_operand.vmem [shape: f32[1,128], index: 1, kind: output, shape index: {}]  }
   0x1   :  { %v197_v0 = vld [vmem:[%s399_s0 + $0x1f] sm:$0x1]   ;;  %v199_v1 = vld [vmem:[%s399_s0 + $0x1d] sm:$0x1]   ;;  %v198_v2 = vld [vmem:[%s399_s0 + $0x1e] sm:$0x1]  }
   0x2   :  { %7 = vrot.lane.b32.xlu0 %v197_v0, %s259_s10  ;;  %19 = vrot.lane.b32.xlu1 %v199_v1, %s260_s11  ;;  %v200_v3 = vld [vmem:[%s399_s0 + $0x1c] sm:$0x1]   ;;  %s261_s16 = smov 120   ;;  %s262_s17 = smov 112   ;;  %v201_v4 = vld [vmem:[%s399_s0 + $0x1b] sm:$0x1]  }
   0x3   :  { %v202_v5 = vld [vmem:[%s399_s0 + $0x1a] sm:$0x1]   ;;  %s263_s22 = smov 108   ;;  %s264_s23 = smov 104   ;;  %v203_v6 = vld [vmem:[%s399_s0 + $0x19] sm:$0x1]  }
   0x4   :  { %v204_v7 = vld [vmem:[%s399_s0 + $0x18] sm:$0x1]   ;;  %s265_s28 = smov 100   ;;  %s266_s29 = smov 96   ;;  %v205_v8 = vld [vmem:[%s399_s0 + $0x17] sm:$0x1]  }
   0x5   :  { %v206_v9 = vld [vmem:[%s399_s0 + $0x16] sm:$0x1]   ;;  %v2_v10 = vld [vmem:[%s399_s0] sm:$0x1]   ;;  %s267_s7 = smov 92   ;;  %s268_s8 = smov 88  }
   0x6   :  { %13 = vrot.lane.b32.xlu0 %v198_v2, %s261_s16  ;;  %25 = vrot.lane.b32.xlu1 %v200_v3, %s262_s17  ;;  %4 = vst.msk [vmem:[#allocation0] sm:$0x1] %vm3_vm0, %v2_v10   ;;  %v207_v11 = vld [vmem:[%s399_s0 + $0x15] sm:$0x1]   ;;  %v208_v12 = vld [vmem:[%s399_s0 + $0x14] sm:$0x1]  }
   0x7   :  { %s269_s13 = smov 84   ;;  %s270_s14 = smov 80   ;;  %v209_v13 = vld [vmem:[%s399_s0 + $0x13] sm:$0x1]   ;;  %v210_v14 = vld [vmem:[%s399_s0 + $0x12] sm:$0x1]  }
   0x8   :  { %s271_s19 = smov 76   ;;  %s272_s20 = smov 72   ;;  %v211_v15 = vld [vmem:[%s399_s0 + $0x11] sm:$0x1]   ;;  %v212_v16 = vld [vmem:[%s399_s0 + $0x10] sm:$0x1]  }
   0x9   :  { %s273_s25 = smov 68   ;;  %s274_s26 = smov 64   ;;  %v213_v17 = vld [vmem:[%s399_s0 + $0xf] sm:$0x1]   ;;  %v214_v18 = vld [vmem:[%s399_s0 + $0xe] sm:$0x1]  }
   0xa   :  { %31 = vrot.lane.b32.xlu0 %v201_v4, %s263_s22  ;;  %37 = vrot.lane.b32.xlu1 %v202_v5, %s264_s23  ;;  %s275_s2 = smov 60   ;;  %s276_s3 = smov 56   ;;  %v215_v19 = vld [vmem:[%s399_s0 + $0xd] sm:$0x1]   ;;  %v216_v20 = vld [vmem:[%s399_s0 + $0xc] sm:$0x1]  }
   0xb   :  { %s278_s9 = smov 48   ;;  %v217_v21 = vld [vmem:[%s399_s0 + $0xb] sm:$0x1]   ;;  %v218_v22 = vld [vmem:[%s399_s0 + $0xa] sm:$0x1]   ;;  %s280_s15 = smov 40  }
   0xc   :  { %v219_v23 = vld [vmem:[%s399_s0 + $0x9] sm:$0x1]   ;;  %v220_v24 = vld [vmem:[%s399_s0 + $0x8] sm:$0x1]   ;;  %s282_s21 = smov 32   ;;  %s284_s27 = smov 24  }
   0xd   :  { %v221_v25 = vld [vmem:[%s399_s0 + $0x7] sm:$0x1]   ;;  %v222_v26 = vld [vmem:[%s399_s0 + $0x6] sm:$0x1]   ;;  %v223_v27 = vld [vmem:[%s399_s0 + $0x5] sm:$0x1]  }
   0xe   :  { %43 = vrot.lane.b32.xlu0 %v203_v6, %s265_s28  ;;  %49 = vrot.lane.b32.xlu1 %v204_v7, %s266_s29  ;;  %v224_v28 = vld [vmem:[%s399_s0 + $0x4] sm:$0x1]   ;;  %s286_s4 = smov 16   ;;  %v225_v29 = vld [vmem:[%s399_s0 + $0x3] sm:$0x1]   ;;  %s288_s10 = smov 8  }
   0xf   :  { %v226_v30 = vld [vmem:[%s399_s0 + $0x2] sm:$0x1]   ;;  %v227_v31 = vld [vmem:[%s399_s0 + $0x1] sm:$0x1]   ;;  %s289_s0 = smov 4   ;;  %vm27_vm4 = vcmask 950144  }
  0x10   :  { %vm33_vm5 = vcmask 917344   ;;  %vm39_vm6 = vcmask 884544   ;;  %vm45_vm7 = vcmask 851744   ;;  %vm51_vm8 = vcmask 818944  }
  0x11   :  { %vm57_vm9 = vcmask 786144   ;;  %vm63_vm10 = vcmask 753344   ;;  %vm69_vm11 = vcmask 720544   ;;  %vm75_vm12 = vcmask 687744  }
  0x12   :  { %55 = vrot.lane.b32.xlu0 %v205_v8, %s267_s7  ;;  %61 = vrot.lane.b32.xlu1 %v206_v9, %s268_s8  ;;  %s277_s8 = smov 52   ;;  %vm81_vm13 = vcmask 654944   ;;  %vm87_vm14 = vcmask 622144   ;;  %vm93_vm15 = vcmask 589344   ;;  %vm99_vm0 = vcmask 556544  }
  0x16   :  { %67 = vrot.lane.b32.xlu0 %v207_v11, %s269_s13  ;;  %73 = vrot.lane.b32.xlu1 %v208_v12, %s270_s14  ;;  %s279_s14 = smov 44  }
  0x1a   :  { %79 = vrot.lane.b32.xlu0 %v209_v13, %s271_s19  ;;  %85 = vrot.lane.b32.xlu1 %v210_v14, %s272_s20  ;;  %s281_s20 = smov 36  }
  0x1e   :  { %91 = vrot.lane.b32.xlu0 %v211_v15, %s273_s25  ;;  %97 = vrot.lane.b32.xlu1 %v212_v16, %s274_s26  ;;  %s283_s26 = smov 28  }
  0x22   :  { %103 = vrot.lane.b32.xlu0 %v213_v17, %s275_s2  ;;  %109 = vrot.lane.b32.xlu1 %v214_v18, %s276_s3  ;;  %s285_s3 = smov 20  }
  0x26   :  { %115 = vrot.lane.b32.xlu0 %v215_v19, %s277_s8  ;;  %121 = vrot.lane.b32.xlu1 %v216_v20, %s278_s9  ;;  %s287_s9 = smov 12  }
  0x2a   :  { %127 = vrot.lane.b32.xlu0 %v217_v21, %s279_s14  ;;  %133 = vrot.lane.b32.xlu1 %v218_v22, %s280_s15 }
  0x2e   :  { %139 = vrot.lane.b32.xlu0 %v219_v23, %s281_s20  ;;  %145 = vrot.lane.b32.xlu1 %v220_v24, %s282_s21 }
  0x32   :  { %151 = vrot.lane.b32.xlu0 %v221_v25, %s283_s26  ;;  %157 = vrot.lane.b32.xlu1 %v222_v26, %s284_s27 }
  0x36   :  { %163 = vrot.lane.b32.xlu0 %v223_v27, %s285_s3  ;;  %169 = vrot.lane.b32.xlu1 %v224_v28, %s286_s4 }
  0x3a   :  { %175 = vrot.lane.b32.xlu0 %v225_v29, %s287_s9  ;;  %181 = vrot.lane.b32.xlu1 %v226_v30, %s288_s10 }
  0x3e   :  { %187 = vrot.lane.b32.xlu0 %v227_v31, %s289_s0 }
  0x74   :  { %v8_v32 = vpop.permute.xlu0 %7   ;;  %v20_v33 = vpop.permute.xlu1 %19  }
  0x75   :  { %10 = vst.msk [vmem:[#allocation0] sm:$0x1] %vm9_vm1, %v8_v32   ;;  %vm105_vm1 = vcmask 523744  }
  0x78   :  { %v14_v34 = vpop.permute.xlu0 %13   ;;  %v26_v35 = vpop.permute.xlu1 %25  }
  0x79   :  { %16 = vst.msk [vmem:[#allocation0] sm:$0x1] %vm15_vm2, %v14_v34   ;;  %vm111_vm2 = vcmask 490944  }
  0x7a   :  { %22 = vst.msk [vmem:[#allocation0] sm:$0x1] %vm21_vm3, %v20_v33   ;;  %vm117_vm3 = vcmask 458144  }
  0x7b   :  { %28 = vst.msk [vmem:[#allocation0] sm:$0x1] %vm27_vm4, %v26_v35   ;;  %vm123_vm4 = vcmask 425344  }
  0x7c   :  { %v32_v36 = vpop.permute.xlu0 %31   ;;  %v38_v37 = vpop.permute.xlu1 %37  }
  0x7d   :  { %34 = vst.msk [vmem:[#allocation0] sm:$0x1] %vm33_vm5, %v32_v36   ;;  %vm129_vm5 = vcmask 392544  }
  0x7e   :  { %40 = vst.msk [vmem:[#allocation0] sm:$0x1] %vm39_vm6, %v38_v37   ;;  %vm135_vm6 = vcmask 359744  }
  0x80   :  { %v44_v38 = vpop.permute.xlu0 %43   ;;  %v50_v39 = vpop.permute.xlu1 %49  }
  0x81   :  { %46 = vst.msk [vmem:[#allocation0] sm:$0x1] %vm45_vm7, %v44_v38   ;;  %vm141_vm7 = vcmask 326944  }
  0x82   :  { %52 = vst.msk [vmem:[#allocation0] sm:$0x1] %vm51_vm8, %v50_v39   ;;  %vm147_vm8 = vcmask 294144  }
  0x84   :  { %v56_v40 = vpop.permute.xlu0 %55   ;;  %v62_v41 = vpop.permute.xlu1 %61  }
  0x85   :  { %58 = vst.msk [vmem:[#allocation0] sm:$0x1] %vm57_vm9, %v56_v40   ;;  %vm153_vm9 = vcmask 261344  }
  0x86   :  { %64 = vst.msk [vmem:[#allocation0] sm:$0x1] %vm63_vm10, %v62_v41   ;;  %vm159_vm10 = vcmask 228544  }
  0x88   :  { %v68_v42 = vpop.permute.xlu0 %67   ;;  %v74_v43 = vpop.permute.xlu1 %73  }
  0x89   :  { %70 = vst.msk [vmem:[#allocation0] sm:$0x1] %vm69_vm11, %v68_v42   ;;  %vm165_vm11 = vcmask 195744  }
  0x8a   :  { %76 = vst.msk [vmem:[#allocation0] sm:$0x1] %vm75_vm12, %v74_v43   ;;  %vm171_vm12 = vcmask 162944  }
  0x8c   :  { %v80_v44 = vpop.permute.xlu0 %79   ;;  %v86_v45 = vpop.permute.xlu1 %85  }
  0x8d   :  { %82 = vst.msk [vmem:[#allocation0] sm:$0x1] %vm81_vm13, %v80_v44   ;;  %vm177_vm13 = vcmask 130144  }
  0x8e   :  { %88 = vst.msk [vmem:[#allocation0] sm:$0x1] %vm87_vm14, %v86_v45   ;;  %vm183_vm14 = vcmask 97344  }
  0x90   :  { %v92_v46 = vpop.permute.xlu0 %91   ;;  %v98_v47 = vpop.permute.xlu1 %97  }
  0x91   :  { %94 = vst.msk [vmem:[#allocation0] sm:$0x1] %vm93_vm15, %v92_v46   ;;  %vm189_vm15 = vcmask 64544  }
  0x92   :  { %100 = vst.msk [vmem:[#allocation0] sm:$0x1] %vm99_vm0, %v98_v47  }
  0x94   :  { %v104_v48 = vpop.permute.xlu0 %103   ;;  %v110_v49 = vpop.permute.xlu1 %109  }
  0x95   :  { %106 = vst.msk [vmem:[#allocation0] sm:$0x1] %vm105_vm1, %v104_v48  }
  0x96   :  { %112 = vst.msk [vmem:[#allocation0] sm:$0x1] %vm111_vm2, %v110_v49  }
  0x98   :  { %v116_v50 = vpop.permute.xlu0 %115   ;;  %v122_v51 = vpop.permute.xlu1 %121  }
  0x99   :  { %118 = vst.msk [vmem:[#allocation0] sm:$0x1] %vm117_vm3, %v116_v50  }
  0x9a   :  { %124 = vst.msk [vmem:[#allocation0] sm:$0x1] %vm123_vm4, %v122_v51  }
  0x9c   :  { %v128_v52 = vpop.permute.xlu0 %127   ;;  %v134_v53 = vpop.permute.xlu1 %133  }
  0x9d   :  { %130 = vst.msk [vmem:[#allocation0] sm:$0x1] %vm129_vm5, %v128_v52  }
  0x9e   :  { %136 = vst.msk [vmem:[#allocation0] sm:$0x1] %vm135_vm6, %v134_v53  }
  0xa0   :  { %v140_v54 = vpop.permute.xlu0 %139   ;;  %v146_v55 = vpop.permute.xlu1 %145  }
  0xa1   :  { %142 = vst.msk [vmem:[#allocation0] sm:$0x1] %vm141_vm7, %v140_v54  }
  0xa2   :  { %148 = vst.msk [vmem:[#allocation0] sm:$0x1] %vm147_vm8, %v146_v55  }
  0xa4   :  { %v152_v56 = vpop.permute.xlu0 %151   ;;  %v158_v57 = vpop.permute.xlu1 %157  }
  0xa5   :  { %154 = vst.msk [vmem:[#allocation0] sm:$0x1] %vm153_vm9, %v152_v56  }
  0xa6   :  { %160 = vst.msk [vmem:[#allocation0] sm:$0x1] %vm159_vm10, %v158_v57  }
  0xa8   :  { %v164_v58 = vpop.permute.xlu0 %163   ;;  %v170_v59 = vpop.permute.xlu1 %169  }
  0xa9   :  { %166 = vst.msk [vmem:[#allocation0] sm:$0x1] %vm165_vm11, %v164_v58  }
  0xaa   :  { %172 = vst.msk [vmem:[#allocation0] sm:$0x1] %vm171_vm12, %v170_v59  }
  0xac   :  { %v176_v60 = vpop.permute.xlu0 %175   ;;  %v182_v61 = vpop.permute.xlu1 %181  }
  0xad   :  { %178 = vst.msk [vmem:[#allocation0] sm:$0x1] %vm177_vm13, %v176_v60  }
  0xae   :  { %184 = vst.msk [vmem:[#allocation0] sm:$0x1] %vm183_vm14, %v182_v61  }
  0xb0   :  { %v188_v62 = vpop.permute.xlu0 %187  }
  0xb1   :  { %190 = vst.msk [vmem:[#allocation0] sm:$0x1] %vm189_vm15, %v188_v62  }
  0xb8   :  { %v194_v63 = vld [vmem:[#allocation0] sm:$0x1] }
  0xb9   :  { %196 = vst [vmem:[%s400_s1] sm:$0x1] %v194_v63 }

// kernel: tile.18
= control target key start
LH: loop header
LB: loop body
LE: loop exit
PB: predicated region body
PF: predicated region fallthrough
CT: control target
= control target key end

     0   :  { %s28_s0 = inlined_call_operand.vmem [shape: f32[8], index: 0, kind: input, shape index: {}]   ;;  %s29_s1 = inlined_call_operand.vmem [shape: f32[16,8], index: 1, kind: output, shape index: {}]  }
   0x1   :  { %v4_v0 = vld [vmem:[%s28_s0] ss:$0 sm:$0xff] }
   0x2   :  { %5 = vst [vmem:[%s29_s1] sm:$0xff] %v4_v0  ;;  %8 = vst [vmem:[%s29_s1 + $0x8] sm:$0xff] %v4_v0 }

// kernel: tile.19
= control target key start
LH: loop header
LB: loop body
LE: loop exit
PB: predicated region body
PF: predicated region fallthrough
CT: control target
= control target key end

     0   :  { %s131_s10 = smov 120   ;;  %s132_s11 = smov 104   ;;  %vm3_vm0 = vcmask 64512   ;;  %vm9_vm1 = vcmask 1048512   ;;  %vm15_vm2 = vcmask 982912   ;;  %vm21_vm3 = vcmask 917312   ;;  %s207_s0 = inlined_call_operand.vmem [shape: f32[16,8], index: 0, kind: input, shape index: {}]   ;;  %s208_s1 = inlined_call_operand.vmem [shape: f32[1,128], index: 1, kind: output, shape index: {}]  }
   0x1   :  { %v101_v0 = vld [vmem:[%s207_s0 + $0xf] sm:$0x1]   ;;  %v103_v1 = vld [vmem:[%s207_s0 + $0xd] sm:$0x1]   ;;  %v102_v2 = vld [vmem:[%s207_s0 + $0xe] sm:$0x1]  }
   0x2   :  { %7 = vrot.lane.b32.xlu0 %v101_v0, %s131_s10  ;;  %19 = vrot.lane.b32.xlu1 %v103_v1, %s132_s11  ;;  %v104_v3 = vld [vmem:[%s207_s0 + $0xc] sm:$0x1]   ;;  %s133_s16 = smov 112   ;;  %s134_s17 = smov 96   ;;  %v105_v4 = vld [vmem:[%s207_s0 + $0xb] sm:$0x1]  }
   0x3   :  { %v106_v5 = vld [vmem:[%s207_s0 + $0xa] sm:$0x1]   ;;  %v2_v6 = vld [vmem:[%s207_s0] sm:$0x1]   ;;  %s135_s24 = smov 88   ;;  %s136_s25 = smov 80  }
   0x4   :  { %4 = vst.msk [vmem:[#allocation0] sm:$0x1] %vm3_vm0, %v2_v6   ;;  %v107_v7 = vld [vmem:[%s207_s0 + $0x9] sm:$0x1]   ;;  %v108_v8 = vld [vmem:[%s207_s0 + $0x8] sm:$0x1]  }
   0x5   :  { %s137_s30 = smov 72   ;;  %s138_s2 = smov 64   ;;  %v109_v9 = vld [vmem:[%s207_s0 + $0x7] sm:$0x1]   ;;  %v110_v10 = vld [vmem:[%s207_s0 + $0x6] sm:$0x1]  }
   0x6   :  { %13 = vrot.lane.b32.xlu0 %v102_v2, %s133_s16  ;;  %25 = vrot.lane.b32.xlu1 %v104_v3, %s134_s17  ;;  %s139_s7 = smov 56   ;;  %s140_s8 = smov 48   ;;  %v111_v11 = vld [vmem:[%s207_s0 + $0x5] sm:$0x1]   ;;  %v112_v12 = vld [vmem:[%s207_s0 + $0x4] sm:$0x1]  }
   0x7   :  { %s141_s13 = smov 40   ;;  %s142_s14 = smov 32   ;;  %v113_v13 = vld [vmem:[%s207_s0 + $0x3] sm:$0x1]   ;;  %v114_v14 = vld [vmem:[%s207_s0 + $0x2] sm:$0x1]  }
   0x8   :  { %s143_s19 = smov 24   ;;  %s144_s20 = smov 16   ;;  %v115_v15 = vld [vmem:[%s207_s0 + $0x1] sm:$0x1]   ;;  %vm27_vm4 = vcmask 851712   ;;  %vm33_vm5 = vcmask 786112  }
   0x9   :  { %s145_s0 = smov 8   ;;  %vm39_vm6 = vcmask 720512   ;;  %vm45_vm7 = vcmask 654912   ;;  %vm51_vm8 = vcmask 589312   ;;  %vm57_vm9 = vcmask 523712  }
   0xa   :  { %31 = vrot.lane.b32.xlu0 %v105_v4, %s135_s24  ;;  %37 = vrot.lane.b32.xlu1 %v106_v5, %s136_s25  ;;  %vm63_vm10 = vcmask 458112   ;;  %vm69_vm11 = vcmask 392512   ;;  %vm75_vm12 = vcmask 326912   ;;  %vm81_vm13 = vcmask 261312  }
   0xb   :  { %vm87_vm14 = vcmask 195712   ;;  %vm93_vm15 = vcmask 130112  }
   0xe   :  { %43 = vrot.lane.b32.xlu0 %v107_v7, %s137_s30  ;;  %49 = vrot.lane.b32.xlu1 %v108_v8, %s138_s2 }
  0x12   :  { %55 = vrot.lane.b32.xlu0 %v109_v9, %s139_s7  ;;  %61 = vrot.lane.b32.xlu1 %v110_v10, %s140_s8 }
  0x16   :  { %67 = vrot.lane.b32.xlu0 %v111_v11, %s141_s13  ;;  %73 = vrot.lane.b32.xlu1 %v112_v12, %s142_s14 }
  0x1a   :  { %79 = vrot.lane.b32.xlu0 %v113_v13, %s143_s19  ;;  %85 = vrot.lane.b32.xlu1 %v114_v14, %s144_s20 }
  0x1e   :  { %91 = vrot.lane.b32.xlu0 %v115_v15, %s145_s0 }
  0x74   :  { %v8_v16 = vpop.permute.xlu0 %7   ;;  %v20_v17 = vpop.permute.xlu1 %19  }
  0x75   :  { %10 = vst.msk [vmem:[#allocation0] sm:$0x1] %vm9_vm1, %v8_v16  }
  0x78   :  { %v14_v18 = vpop.permute.xlu0 %13   ;;  %v26_v19 = vpop.permute.xlu1 %25  }
  0x79   :  { %16 = vst.msk [vmem:[#allocation0] sm:$0x1] %vm15_vm2, %v14_v18  }
  0x7a   :  { %22 = vst.msk [vmem:[#allocation0] sm:$0x1] %vm21_vm3, %v20_v17  }
  0x7b   :  { %28 = vst.msk [vmem:[#allocation0] sm:$0x1] %vm27_vm4, %v26_v19  }
  0x7c   :  { %v32_v20 = vpop.permute.xlu0 %31   ;;  %v38_v21 = vpop.permute.xlu1 %37  }
  0x7d   :  { %34 = vst.msk [vmem:[#allocation0] sm:$0x1] %vm33_vm5, %v32_v20  }
  0x7e   :  { %40 = vst.msk [vmem:[#allocation0] sm:$0x1] %vm39_vm6, %v38_v21  }
  0x80   :  { %v44_v22 = vpop.permute.xlu0 %43   ;;  %v50_v23 = vpop.permute.xlu1 %49  }
  0x81   :  { %46 = vst.msk [vmem:[#allocation0] sm:$0x1] %vm45_vm7, %v44_v22  }
  0x82   :  { %52 = vst.msk [vmem:[#allocation0] sm:$0x1] %vm51_vm8, %v50_v23  }
  0x84   :  { %v56_v24 = vpop.permute.xlu0 %55   ;;  %v62_v25 = vpop.permute.xlu1 %61  }
  0x85   :  { %58 = vst.msk [vmem:[#allocation0] sm:$0x1] %vm57_vm9, %v56_v24  }
  0x86   :  { %64 = vst.msk [vmem:[#allocation0] sm:$0x1] %vm63_vm10, %v62_v25  }
  0x88   :  { %v68_v26 = vpop.permute.xlu0 %67   ;;  %v74_v27 = vpop.permute.xlu1 %73  }
  0x89   :  { %70 = vst.msk [vmem:[#allocation0] sm:$0x1] %vm69_vm11, %v68_v26  }
  0x8a   :  { %76 = vst.msk [vmem:[#allocation0] sm:$0x1] %vm75_vm12, %v74_v27  }
  0x8c   :  { %v80_v28 = vpop.permute.xlu0 %79   ;;  %v86_v29 = vpop.permute.xlu1 %85  }
  0x8d   :  { %82 = vst.msk [vmem:[#allocation0] sm:$0x1] %vm81_vm13, %v80_v28  }
  0x8e   :  { %88 = vst.msk [vmem:[#allocation0] sm:$0x1] %vm87_vm14, %v86_v29  }
  0x90   :  { %v92_v30 = vpop.permute.xlu0 %91  }
  0x91   :  { %94 = vst.msk [vmem:[#allocation0] sm:$0x1] %vm93_vm15, %v92_v30  }
  0x98   :  { %v98_v31 = vld [vmem:[#allocation0] sm:$0x1] }
  0x99   :  { %100 = vst [vmem:[%s208_s1] sm:$0x1] %v98_v31 }

// kernel: decoder_forward.1
= control target key start
LH: loop header
LB: loop body
LE: loop exit
PB: predicated region body
PF: predicated region fallthrough
CT: control target
= control target key end

     0   :  { %s2362_s27 = smov 0   ;;  %s3014_s0 = inlined_call_operand.vmem [shape: f32[2,16,256], index: 0, kind: input, shape index: {}]   ;;  %s3015_s1 = inlined_call_operand.vmem [shape: f32[3,256,128], index: 1, kind: input, shape index: {}]   ;;  %s3016_s2 = inlined_call_operand.vmem [shape: f32[3,128,128], index: 2, kind: input, shape index: {}]   ;;  %s3017_s3 = inlined_call_operand.vmem [shape: f32[3,128,128], index: 3, kind: input, shape index: {}]   ;;  %s3018_s4 = inlined_call_operand.vmem [shape: f32[1,128], index: 4, kind: input, shape index: {}]   ;;  %s3019_s5 = inlined_call_operand.vmem [shape: f32[1,128], index: 5, kind: input, shape index: {}]   ;;  %s3020_s6 = inlined_call_operand.vmem [shape: f32[1,128], index: 6, kind: input, shape index: {}]   ;;  %s3021_s7 = inlined_call_operand.vmem [shape: f32[2,16,128], index: 7, kind: output, shape index: {0}]   ;;  %s3022_s8 = inlined_call_operand.vmem [shape: f32[2,16,128], index: 8, kind: output, shape index: {1}]  }
   0x1 LB: > { %s1426_s28 = sadd.s32 4294967295, %s2314_s27   ;;  %p1430_p0 = scmp.ge.s32.totalorder %s2314_s27, 1  ;;  %s2314_s27 = sphi %s2362_s27, %s19_s27  }
   0x2   : > { %p265_p1 = scmp.lt.s32.totalorder %s2314_s27, 3 }
   0x4   : > { %p266_p2 = pnand %p1430_p0, %p265_p1 }
   0x5   : > { %v1453_v0 = vld [vmem:[%s3015_s1 + $0x180] sm:$0xff] (!%p266_p2)  ;;  %v1454_v1 = vld [vmem:[%s3015_s1 + $0x188] sm:$0xff] (!%p266_p2)  ;;  %v319_v3 = vlaneseq (!%p266_p2)  ;;  %v1455_v12 = vld [vmem:[%s3015_s1 + $0x190] sm:$0xff] (!%p266_p2)  ;;  %v2316_v13 = vmov (!%p266_p2), 0.0   ;;  %p2444_p3 = scmp.lt.s32.totalorder (!%p266_p2), %s1426_s28, 1  ;;  %vm336_vm1 = vcmask (!%p266_p2), 1040384  }
   0x6   : > { %269 = sbr.rel (%p266_p2) target bundleno = 862 (0x35e), region = 48  ;;  %v375_v2 = vld [vmem:[%s3015_s1 + $0x80] sm:$0xff] (!%p266_p2)  ;;  %v2005_v4 = vpack.c.bf16 (!%p266_p2), %v1454_v1, %v1453_v0  ;;  %v376_v5 = vld [vmem:[%s3015_s1 + $0x88] sm:$0xff] (!%p266_p2)  ;;  %743 = vst [vmem:[#allocation3] sm:$0x1] (!%p266_p2), %v2316_v13  ;;  %v1456_v15 = vld [vmem:[%s3015_s1 + $0x198] sm:$0xff] (!%p266_p2) }
   0x7   : > { %v1437_v6 = vld [vmem:[%s3015_s1 + $0x100] sm:$0xff] (!%p266_p2)  ;;  %v1438_v7 = vld [vmem:[%s3015_s1 + $0x108] sm:$0xff] (!%p266_p2)  ;;  %v2037_v8 = vpack.c.bf16 (!%p266_p2), %v376_v5, %v375_v2  ;;  %vm321_vm0 = vcmp.lt.s32.totalorder (!%p266_p2), %v319_v3, 256  ;;  %744 = vst [vmem:[#allocation3 + $0x11] sm:$0x1] (!%p266_p2), %v2316_v13  ;;  %v377_v16 = vld [vmem:[%s3015_s1 + $0x90] sm:$0xff] (!%p266_p2)  ;;  %v2009_v18 = vpack.c.bf16 (!%p266_p2), %v1456_v15, %v1455_v12 }
   0x8   : > { %v2007_v9 = vpack.c.bf16 (!%p266_p2), %v1438_v7, %v1437_v6  ;;  %v359_v10 = vld [vmem:[%s3015_s1] sm:$0xff] (!%p266_p2)  ;;  %v360_v11 = vld [vmem:[%s3015_s1 + $0x8] sm:$0xff] (!%p266_p2)  ;;  %1043 = vst [vmem:[#allocation4 + $0x10] sm:$0x1] (!%p266_p2), %v2316_v13  ;;  %2006 = vmatprep.subr.bf16.mxu0 (!%p266_p2), %v2005_v4  ;;  %v378_v17 = vld [vmem:[%s3015_s1 + $0x98] sm:$0xff] (!%p266_p2)  ;;  %vm434_vm2 = vcmask (!%p266_p2), 1046528  }
   0x9   : > { %v2039_v14 = vpack.c.bf16 (!%p266_p2), %v360_v11, %v359_v10  ;;  %323 = vst.msk [vmem:[#allocation2] ss:$8 sm:$0x3] (!%p266_p2), %vm321_vm0, %v2316_v13  ;;  %326 = vst.msk [vmem:[#allocation2 + $0x21] ss:$8 sm:$0x3] (!%p266_p2), %vm321_vm0, %v2316_v13  ;;  %2038 = vmatprep.subr.bf16.mxu1 (!%p266_p2), %v2037_v8  ;;  %v2041_v19 = vpack.c.bf16 (!%p266_p2), %v378_v17, %v377_v16 }
   0xa   : > { %2008 = vmatpush3.bf16.msra.mxu0 (!%p266_p2), %v2007_v9  ;;  %v1439_v20 = vld [vmem:[%s3015_s1 + $0x110] sm:$0xff] (!%p266_p2)  ;;  %v1440_v21 = vld [vmem:[%s3015_s1 + $0x118] sm:$0xff] (!%p266_p2)  ;;  %v1457_v25 = vld [vmem:[%s3015_s1 + $0x1a0] sm:$0xff] (!%p266_p2)  ;;  %vm640_vm3 = vcmask (!%p266_p2), 1045504  }
   0xb   : > { %v361_v22 = vld [vmem:[%s3015_s1 + $0x10] sm:$0xff] (!%p266_p2)  ;;  %2040 = vmatpush3.bf16.msra.mxu1 (!%p266_p2), %v2039_v14  ;;  %v2011_v23 = vpack.c.bf16 (!%p266_p2), %v1440_v21, %v1439_v20  ;;  %v362_v24 = vld [vmem:[%s3015_s1 + $0x18] sm:$0xff] (!%p266_p2)  ;;  %v1458_v26 = vld [vmem:[%s3015_s1 + $0x1a8] sm:$0xff] (!%p266_p2)  ;;  %2010 = vmatprep.subr.bf16.mxu0 (!%p266_p2), %v2009_v18 }
   0xc   : > { %2042 = vmatprep.subr.bf16.mxu1 (!%p266_p2), %v2041_v19  ;;  %v2043_v27 = vpack.c.bf16 (!%p266_p2), %v362_v24, %v361_v22  ;;  %v2013_v28 = vpack.c.bf16 (!%p266_p2), %v1458_v26, %v1457_v25  ;;  %v379_v29 = vld [vmem:[%s3015_s1 + $0xa0] sm:$0xff] (!%p266_p2)  ;;  %v380_v30 = vld [vmem:[%s3015_s1 + $0xa8] sm:$0xff] (!%p266_p2)  ;;  %v1459_v37 = vld [vmem:[%s3015_s1 + $0x1b0] sm:$0xff] (!%p266_p2) }
   0xd   : > { %v1441_v31 = vld [vmem:[%s3015_s1 + $0x120] sm:$0xff]  ;;  %v2045_v32 = vpack.c.bf16 %v380_v30, %v379_v29  ;;  %v1442_v33 = vld [vmem:[%s3015_s1 + $0x128] sm:$0xff]  ;;  %v1460_v38 = vld [vmem:[%s3015_s1 + $0x1b8] sm:$0xff]  ;;  %s3025_s28 = smov (!%p2444_p3, %s1426_s28), 1 }
   0xe   : > { %v363_v34 = vld [vmem:[%s3015_s1 + $0x20] sm:$0xff]  ;;  %v364_v35 = vld [vmem:[%s3015_s1 + $0x28] sm:$0xff]  ;;  %2012 = vmatpush3.bf16.msra.mxu0 %v2011_v23  ;;  %v2015_v36 = vpack.c.bf16 %v1442_v33, %v1441_v31  ;;  %v381_v39 = vld [vmem:[%s3015_s1 + $0xb0] sm:$0xff]  ;;  %v2017_v41 = vpack.c.bf16 %v1460_v38, %v1459_v37  ;;  %s1570_s17 = sshll.u32 %s3025_s28, 5  ;;  %s1571_s23 = sshll.u32 %s3025_s28, 4 }
   0xf   : > { %2044 = vmatpush3.bf16.msra.mxu1 %v2043_v27  ;;  %2014 = vmatprep.subr.bf16.mxu0 %v2013_v28  ;;  %v2047_v40 = vpack.c.bf16 %v364_v35, %v363_v34  ;;  %v382_v42 = vld [vmem:[%s3015_s1 + $0xb8] sm:$0xff]  ;;  %v1443_v43 = vld [vmem:[%s3015_s1 + $0x130] sm:$0xff]  ;;  %v1461_v48 = vld [vmem:[%s3015_s1 + $0x1c0] sm:$0xff]  ;;  %s308_s11 = scalar_lea.vmem %s3014_s0, %s1570_s17  ;;  %s313_s26 = scalar_lea.vmem %s3021_s7, %s1571_s23 }
  0x10   : > { %v1444_v44 = vld [vmem:[%s3015_s1 + $0x138] sm:$0xff]  ;;  %2046 = vmatprep.subr.bf16.mxu1 %v2045_v32  ;;  %v2049_v45 = vpack.c.bf16 %v382_v42, %v381_v39  ;;  %v365_v46 = vld [vmem:[%s3015_s1 + $0x30] sm:$0xff]  ;;  %v1462_v49 = vld [vmem:[%s3015_s1 + $0x1c8] sm:$0xff]  ;;  %s318_s30 = scalar_lea.vmem %s3022_s8, %s1571_s23 }
  0x11   : > { %v366_v47 = vld [vmem:[%s3015_s1 + $0x38] sm:$0xff]  ;;  %v383_v50 = vld [vmem:[%s3015_s1 + $0xc0] sm:$0xff]  ;;  %v384_v51 = vld [vmem:[%s3015_s1 + $0xc8] sm:$0xff]  ;;  %v2019_v52 = vpack.c.bf16 %v1444_v44, %v1443_v43  ;;  %v2021_v54 = vpack.c.bf16 %v1462_v49, %v1461_v48 }
  0x12   : > { %2016 = vmatpush3.bf16.msra.mxu0 %v2015_v36  ;;  %v2051_v53 = vpack.c.bf16 %v366_v47, %v365_v46  ;;  %v1445_v55 = vld [vmem:[%s3015_s1 + $0x140] sm:$0xff]  ;;  %v1446_v56 = vld [vmem:[%s3015_s1 + $0x148] sm:$0xff]  ;;  %v2053_v58 = vpack.c.bf16 %v384_v51, %v383_v50  ;;  %v1463_v60 = vld [vmem:[%s3015_s1 + $0x1d0] sm:$0xff] }
  0x13   : > { %2048 = vmatpush3.bf16.msra.mxu1 %v2047_v40  ;;  %2018 = vmatprep.subr.bf16.mxu0 %v2017_v41  ;;  %v367_v57 = vld [vmem:[%s3015_s1 + $0x40] sm:$0xff]  ;;  %v368_v59 = vld [vmem:[%s3015_s1 + $0x48] sm:$0xff]  ;;  %v1464_v61 = vld [vmem:[%s3015_s1 + $0x1d8] sm:$0xff]  ;;  %v2023_v0 = vpack.c.bf16 %v1446_v56, %v1445_v55 }
  0x14   : > { %2050 = vmatprep.subr.bf16.mxu1 %v2049_v45  ;;  %v385_v62 = vld [vmem:[%s3015_s1 + $0xd0] sm:$0xff]  ;;  %v386_v63 = vld [vmem:[%s3015_s1 + $0xd8] sm:$0xff]  ;;  %v2055_v1 = vpack.c.bf16 %v368_v59, %v367_v57  ;;  %v2025_v2 = vpack.c.bf16 %v1464_v61, %v1463_v60  ;;  %v1465_v8 = vld [vmem:[%s3015_s1 + $0x1e0] sm:$0xff] }
  0x15   : > { %v1447_v3 = vld [vmem:[%s3015_s1 + $0x150] sm:$0xff]  ;;  %v1448_v4 = vld [vmem:[%s3015_s1 + $0x158] sm:$0xff]  ;;  %v2057_v6 = vpack.c.bf16 %v386_v63, %v385_v62  ;;  %v1466_v9 = vld [vmem:[%s3015_s1 + $0x1e8] sm:$0xff] }
  0x16   : > { %2020 = vmatpush3.bf16.msra.mxu0 %v2019_v52  ;;  %v369_v5 = vld [vmem:[%s3015_s1 + $0x50] sm:$0xff]  ;;  %v370_v7 = vld [vmem:[%s3015_s1 + $0x58] sm:$0xff]  ;;  %v387_v10 = vld [vmem:[%s3015_s1 + $0xe0] sm:$0xff]  ;;  %v2027_v13 = vpack.c.bf16 %v1448_v4, %v1447_v3  ;;  %v2029_v18 = vpack.c.bf16 %v1466_v9, %v1465_v8 }
  0x17   : > { %2052 = vmatpush3.bf16.msra.mxu1 %v2051_v53  ;;  %2022 = vmatprep.subr.bf16.mxu0 %v2021_v54  ;;  %v388_v11 = vld [vmem:[%s3015_s1 + $0xe8] sm:$0xff]  ;;  %v1449_v12 = vld [vmem:[%s3015_s1 + $0x160] sm:$0xff]  ;;  %v2059_v17 = vpack.c.bf16 %v370_v7, %v369_v5  ;;  %v1467_v19 = vld [vmem:[%s3015_s1 + $0x1f0] sm:$0xff] }
  0x18   : > { %2054 = vmatprep.subr.bf16.mxu1 %v2053_v58  ;;  %v1450_v14 = vld [vmem:[%s3015_s1 + $0x168] sm:$0xff]  ;;  %v371_v15 = vld [vmem:[%s3015_s1 + $0x60] sm:$0xff]  ;;  %v331_v21 = vld [vmem:[%s308_s11 + $0x18] sm:$0xff]  ;;  %v2061_v22 = vpack.c.bf16 %v388_v11, %v387_v10 }
  0x19   : > { %v372_v16 = vld [vmem:[%s3015_s1 + $0x68] sm:$0xff]  ;;  %v1468_v23 = vld [vmem:[%s3015_s1 + $0x1f8] sm:$0xff]  ;;  %v341_v25 = vrot.slane %v331_v21, 7  ;;  %v328_v26 = vld [vmem:[%s308_s11] sm:$0xff]  ;;  %v2031_v32 = vpack.c.bf16 %v1450_v14, %v1449_v12 }
  0x1a   : > { %2024 = vmatpush3.bf16.msra.mxu0 %v2023_v0  ;;  %v329_v20 = vld [vmem:[%s308_s11 + $0x8] sm:$0xff]  ;;  %v330_v27 = vld [vmem:[%s308_s11 + $0x10] sm:$0xff]  ;;  %v390_v29 = vld [vmem:[%s3015_s1 + $0xf8] sm:$0xff]  ;;  %v337_v30 = vrot.slane %v328_v26, 7  ;;  %v2063_v34 = vpack.c.bf16 %v372_v16, %v371_v15  ;;  %v2033_v35 = vpack.c.bf16 %v1468_v23, %v1467_v19 }
  0x1b   : > { %2056 = vmatpush3.bf16.msra.mxu1 %v2055_v1  ;;  %2026 = vmatprep.subr.bf16.mxu0 %v2025_v2  ;;  %v338_v24 = vrot.slane %v329_v20, 7  ;;  %v389_v28 = vld [vmem:[%s3015_s1 + $0xf0] sm:$0xff]  ;;  %v339_v31 = vrot.slane %v330_v27, 7  ;;  %354 = vst [vmem:[#allocation2 + $0x28] sm:$0x1] %v341_v25  ;;  %v1452_v37 = vld [vmem:[%s3015_s1 + $0x178] sm:$0xff] }
  0x1c   : > { %2058 = vmatprep.subr.bf16.mxu1 %v2057_v6  ;;  %v1451_v36 = vld [vmem:[%s3015_s1 + $0x170] sm:$0xff]  ;;  %349 = vst [vmem:[#allocation2] sm:$0xfe] %v337_v30  ;;  %v2065_v40 = vpack.c.bf16 %v390_v29, %v389_v28  ;;  %v374_v41 = vld [vmem:[%s3015_s1 + $0x78] sm:$0xff]  ;;  %v1485_v42 = vld [vmem:[%s3015_s1 + $0x280] sm:$0xff] }
  0x1d   : > { %v2567_v33 = vsel %vm336_vm1, %v338_v24, %v341_v25  ;;  %350 = vst [vmem:[#allocation2 + $0x8] sm:$0xfe] %v338_v24  ;;  %v373_v38 = vld [vmem:[%s3015_s1 + $0x70] sm:$0xff]  ;;  %v2579_v39 = vsel %vm336_vm1, %v337_v30, %v339_v31  ;;  %353 = vst [vmem:[#allocation2 + $0x20] sm:$0x1] %v339_v31  ;;  %v1486_v43 = vld [vmem:[%s3015_s1 + $0x288] sm:$0xff]  ;;  %v2035_v44 = vpack.c.bf16 %v1452_v37, %v1451_v36 }
  0x1e   : > { %2028 = vmatpush3.bf16.msra.mxu0 %v2027_v13  ;;  %v2067_v45 = vpack.c.bf16 %v374_v41, %v373_v38  ;;  %v2069_v46 = vpack.c.bf16 %v1486_v43, %v1485_v42  ;;  %v1469_v47 = vld [vmem:[%s3015_s1 + $0x200] sm:$0xff]  ;;  %v439_v48 = vrot.slane %v2567_v33, 1  ;;  %v1470_v49 = vld [vmem:[%s3015_s1 + $0x208] sm:$0xff]  ;;  %v1487_v50 = vld [vmem:[%s3015_s1 + $0x290] sm:$0xff]  ;;  %v436_v54 = vrot.slane %v2579_v39, 1 }
  0x1f   : > { %2060 = vmatpush3.bf16.msra.mxu1 %v2059_v17  ;;  %2030 = vmatprep.subr.bf16.mxu0 %v2029_v18  ;;  %v1488_v51 = vld [vmem:[%s3015_s1 + $0x298] sm:$0xff]  ;;  %v2071_v59 = vpack.c.bf16 %v1470_v49, %v1469_v47  ;;  %v1471_v0 = vld [vmem:[%s3015_s1 + $0x210] sm:$0xff]  ;;  %v645_v4 = vrot.slane %v2567_v33, 2  ;;  %v1489_v6 = vld [vmem:[%s3015_s1 + $0x2a0] sm:$0xff] }
  0x20   : > { %2062 = vmatprep.subr.bf16.mxu1 %v2061_v22  ;;  %v2073_v60 = vpack.c.bf16 %v1488_v51, %v1487_v50  ;;  %v1472_v1 = vld [vmem:[%s3015_s1 + $0x218] sm:$0xff]  ;;  %v1490_v7 = vld [vmem:[%s3015_s1 + $0x2a8] sm:$0xff]  ;;  %v1473_v14 = vld [vmem:[%s3015_s1 + $0x220] sm:$0xff] }
  0x21   : > { %v2075_v11 = vpack.c.bf16 %v1472_v1, %v1471_v0  ;;  %v2077_v13 = vpack.c.bf16 %v1490_v7, %v1489_v6  ;;  %v1474_v15 = vld [vmem:[%s3015_s1 + $0x228] sm:$0xff]  ;;  %v1491_v17 = vld [vmem:[%s3015_s1 + $0x2b0] sm:$0xff]  ;;  %v1492_v18 = vld [vmem:[%s3015_s1 + $0x2b8] sm:$0xff] }
  0x22   : > { %2032 = vmatpush3.bf16.msra.mxu0 %v2031_v32  ;;  %v394_v61 = vld [vmem:[#allocation2 + $0x28] sm:$0x1]  ;;  %v2079_v19 = vpack.c.bf16 %v1474_v15, %v1473_v14  ;;  %v2081_v20 = vpack.c.bf16 %v1492_v18, %v1491_v17  ;;  %v1475_v21 = vld [vmem:[%s3015_s1 + $0x230] sm:$0xff]  ;;  %v1476_v22 = vld [vmem:[%s3015_s1 + $0x238] sm:$0xff] }
  0x23   : > { %2064 = vmatpush3.bf16.msra.mxu1 %v2063_v34  ;;  %2034 = vmatprep.subr.bf16.mxu0 %v2033_v35  ;;  %v391_v56 = vld [vmem:[#allocation2] sm:$0xfe]  ;;  %v443_v2 = vrot.slane %v394_v61, 1  ;;  %v1494_v24 = vld [vmem:[%s3015_s1 + $0x2c8] sm:$0xff]  ;;  %v2083_v25 = vpack.c.bf16 %v1476_v22, %v1475_v21  ;;  %v1495_v29 = vld [vmem:[%s3015_s1 + $0x2d0] sm:$0xff] }
  0x24   : > { %2066 = vmatprep.subr.bf16.mxu1 %v2065_v40  ;;  %v392_v52 = vld [vmem:[#allocation2 + $0x8] sm:$0xfe]  ;;  %v435_v57 = vrot.slane %v391_v56, 1  ;;  %v355_v58 = vld [vmem:[#allocation2] sm:$0xff]  ;;  %v1496_v30 = vld [vmem:[%s3015_s1 + $0x2d8] sm:$0xff] }
  0x25   : > { %v356_v53 = vld [vmem:[#allocation2 + $0x8] sm:$0xff]  ;;  %v438_v55 = vrot.slane %v392_v52, 1  ;;  %v393_v62 = vld [vmem:[#allocation2 + $0x20] sm:$0x1]  ;;  %v444_v9 = vsel %vm434_vm2, %v439_v48, %v443_v2  ;;  %v2089_v32 = vpack.c.bf16 %v1496_v30, %v1495_v29  ;;  %v1479_v34 = vld [vmem:[%s3015_s1 + $0x250] sm:$0xff] }
  0x26   : > { %2036 = vmatpush3.bf16.msra.mxu0 %v2035_v44  ;;  %588 = vmatprep.mubr.f32.mxu1 %v356_v53  ;;  %v441_v3 = vrot.slane %v393_v62, 1  ;;  %v437_v5 = vsel %vm434_vm2, %v435_v57, %v436_v54  ;;  %v600_v8 = vld [vmem:[#allocation2 + $0x8] sm:$0xfc]  ;;  %v1493_v23 = vld [vmem:[%s3015_s1 + $0x2c0] sm:$0xff]  ;;  %v1480_v35 = vld [vmem:[%s3015_s1 + $0x258] sm:$0xff]  ;;  %v642_v53 = vrot.slane %v2579_v39, 2 }
  0x27   : > { %2068 = vmatpush3.bf16.msra.mxu1 %v2067_v45  ;;  %2070 = vmatprep.subr.bf16.mxu0 %v2069_v46  ;;  %v440_v63 = vsel %vm434_vm2, %v438_v55, %v439_v48  ;;  %v644_v10 = vrot.slane %v600_v8, 2  ;;  %v2085_v26 = vpack.c.bf16 %v1494_v24, %v1493_v23  ;;  %v1477_v27 = vld [vmem:[%s3015_s1 + $0x240] sm:$0xff]  ;;  %v1478_v28 = vld [vmem:[%s3015_s1 + $0x248] sm:$0xff]  ;;  %v2091_v38 = vpack.c.bf16 %v1480_v35, %v1479_v34  ;;  %v1499_v43 = vld [vmem:[%s3015_s1 + $0x2f0] sm:$0xff] }
  0x28   : > { %513 = vmatprep.mubr.f32.mxu0 %v440_v63  ;;  %v442_v12 = vsel %vm434_vm2, %v436_v54, %v441_v3  ;;  %v2087_v31 = vpack.c.bf16 %v1478_v28, %v1477_v27  ;;  %v1497_v36 = vld [vmem:[%s3015_s1 + $0x2e0] sm:$0xff]  ;;  %v1498_v37 = vld [vmem:[%s3015_s1 + $0x2e8] sm:$0xff]  ;;  %v1500_v44 = vld [vmem:[%s3015_s1 + $0x2f8] sm:$0xff] }
  0x29   : > { %514 = vmatmul.mubr.f32.vlgmr.msra.gmra.mrb[0].mxu0 %v437_v5  ;;  %v646_v16 = vsel %vm640_vm3, %v644_v10, %v645_v4  ;;  %v2093_v40 = vpack.c.bf16 %v1498_v37, %v1497_v36  ;;  %v1481_v41 = vld [vmem:[%s3015_s1 + $0x260] sm:$0xff]  ;;  %v1482_v42 = vld [vmem:[%s3015_s1 + $0x268] sm:$0xff]  ;;  %v2097_v46 = vpack.c.bf16 %v1500_v44, %v1499_v43  ;;  %v1483_v47 = vld [vmem:[%s3015_s1 + $0x270] sm:$0xff] }
  0x2a   : > { %589 = vmatmul.mubr.f32.vlgmr.msra.gmra.mrb[0].mxu1 %v355_v58  ;;  %2072 = vmatpush3.bf16.msra.mxu0 %v2071_v59  ;;  %v2095_v45 = vpack.c.bf16 %v1482_v42, %v1481_v41  ;;  %v1484_v48 = vld [vmem:[%s3015_s1 + $0x278] sm:$0xff]  ;;  %v599_v49 = vld [vmem:[#allocation2] sm:$0xfc]  ;;  %v602_v50 = vld [vmem:[#allocation2 + $0x28] sm:$0x3] }
  0x2b   : > { %518 = vmatprep.mubr.f32.mxu0 %v444_v9  ;;  %2074 = vmatprep.subr.bf16.mxu0 %v2073_v60  ;;  %v2099_v51 = vpack.c.bf16 %v1484_v48, %v1483_v47  ;;  %v641_v52 = vrot.slane %v599_v49, 2  ;;  %v649_v54 = vrot.slane %v602_v50, 2  ;;  %v601_v55 = vld [vmem:[#allocation2 + $0x20] sm:$0x3]  ;;  %v1503_v60 = vld [vmem:[%s3016_s2 + $0x88] sm:$0xff]  ;;  %v1504_v61 = vld [vmem:[%s3016_s2 + $0x90] sm:$0xff] }
  0x2c   : > { %593 = vmatprep.mubr.f32.mxu1 %v2567_v33  ;;  %v647_v57 = vrot.slane %v601_v55, 2  ;;  %v1505_v62 = vld [vmem:[%s3016_s2 + $0x98] sm:$0xff]  ;;  %v1506_v0 = vld [vmem:[%s3016_s2 + $0xa0] sm:$0xff]  ;;  %v1507_v1 = vld [vmem:[%s3016_s2 + $0xa8] sm:$0xff] }
  0x2d   : > { %519 = vmatmul.mubr.f32.gmra.mrb[2].mxu0 %v442_v12  ;;  %v643_v56 = vsel %vm640_vm3, %v641_v52, %v642_v53  ;;  %v650_v58 = vsel %vm640_vm3, %v645_v4, %v649_v54  ;;  %v2105_v63 = vpack.c.bf16 %v1505_v62, %v1504_v61  ;;  %v2109_v2 = vpack.c.bf16 %v1507_v1, %v1506_v0  ;;  %v1508_v3 = vld [vmem:[%s3016_s2 + $0xb0] sm:$0xff]  ;;  %v1509_v4 = vld [vmem:[%s3016_s2 + $0xb8] sm:$0xff]  ;;  %v1510_v6 = vld [vmem:[%s3016_s2 + $0xc0] sm:$0xff] }
  0x2e   : > { %594 = vmatmul.mubr.f32.gmra.mrb[2].mxu1 %v2579_v39  ;;  %2076 = vmatpush3.bf16.msra.mxu0 %v2075_v11  ;;  %v648_v59 = vsel %vm640_vm3, %v642_v53, %v647_v57  ;;  %v1502_v39 = vld [vmem:[%s3016_s2 + $0x80] sm:$0xff]  ;;  %v2113_v5 = vpack.c.bf16 %v1509_v4, %v1508_v3  ;;  %v1511_v7 = vld [vmem:[%s3016_s2 + $0xc8] sm:$0xff]  ;;  %v1512_v9 = vld [vmem:[%s3016_s2 + $0xd0] sm:$0xff] }
  0x2f   : > { %719 = vmatprep.mubr.f32.mxu0 %v646_v16  ;;  %2078 = vmatprep.subr.bf16.mxu0 %v2077_v13  ;;  %v2101_v33 = vpack.c.bf16 %v1503_v60, %v1502_v39  ;;  %v2117_v8 = vpack.c.bf16 %v1511_v7, %v1510_v6  ;;  %v1513_v10 = vld [vmem:[%s3016_s2 + $0xd8] sm:$0xff]  ;;  %v1514_v12 = vld [vmem:[%s3016_s2 + $0xe0] sm:$0xff]  ;;  %v1515_v13 = vld [vmem:[%s3016_s2 + $0xe8] sm:$0xff] }
  0x30   : > { %v2121_v11 = vpack.c.bf16 %v1513_v10, %v1512_v9  ;;  %v2125_v14 = vpack.c.bf16 %v1515_v13, %v1514_v12  ;;  %v1516_v15 = vld [vmem:[%s3016_s2 + $0xf0] sm:$0xff]  ;;  %v1517_v16 = vld [vmem:[%s3016_s2 + $0xf8] sm:$0xff]  ;;  %v749_v18 = vld [vmem:[%s3016_s2] sm:$0xff] }
  0x31   : > { %2102 = vmatprep.subr.bf16.mxu1 %v2101_v33  ;;  %v2129_v17 = vpack.c.bf16 %v1517_v16, %v1516_v15  ;;  %v1044_v21 = vld [vmem:[%s3017_s3] sm:$0xff]  ;;  %v1045_v22 = vld [vmem:[%s3017_s3 + $0x8] sm:$0xff]  ;;  %v1046_v23 = vld [vmem:[%s3017_s3 + $0x10] sm:$0xff] }
  0x32   : > { %2080 = vmatpush3.bf16.msra.mxu0 %v2079_v19  ;;  %2104 = vmatpush3.bf16.msra.mxu1 %v2101_v33  ;;  %v750_v19 = vld [vmem:[%s3016_s2 + $0x8] sm:$0xff]  ;;  %v2197_v24 = vpack.c.bf16 %v1045_v22, %v1044_v21  ;;  %v1048_v27 = vld [vmem:[%s3017_s3 + $0x20] sm:$0xff]  ;;  %v1050_v30 = vld [vmem:[%s3017_s3 + $0x30] sm:$0xff] }
  0x33   : > { %2082 = vmatprep.subr.bf16.mxu0 %v2081_v20  ;;  %2106 = vmatprep.subr.bf16.mxu1 %v2105_v63  ;;  %v2752_v20 = vpack.c.bf16 %v750_v19, %v749_v18  ;;  %v1049_v28 = vld [vmem:[%s3017_s3 + $0x28] sm:$0xff]  ;;  %v1052_v34 = vld [vmem:[%s3017_s3 + $0x40] sm:$0xff]  ;;  %v1054_v37 = vld [vmem:[%s3017_s3 + $0x50] sm:$0xff] }
  0x34   : > { %v2205_v29 = vpack.c.bf16 %v1049_v28, %v1048_v27  ;;  %v1053_v35 = vld [vmem:[%s3017_s3 + $0x48] sm:$0xff]  ;;  %v1056_v43 = vld [vmem:[%s3017_s3 + $0x60] sm:$0xff]  ;;  %v751_v3 = vld [vmem:[%s3016_s2 + $0x10] sm:$0xff] }
  0x35   : > { %v2213_v36 = vpack.c.bf16 %v1053_v35, %v1052_v34  ;;  %v1057_v44 = vld [vmem:[%s3017_s3 + $0x68] sm:$0xff]  ;;  %v1501_v60 = vld [vmem:[%s3018_s4] ss:$0 sm:$0xff]  ;;  %v752_v4 = vld [vmem:[%s3016_s2 + $0x18] sm:$0xff] }
  0x36   : > { %2084 = vmatpush3.bf16.msra.mxu0 %v2083_v25  ;;  %2108 = vmatpush3.bf16.msra.mxu1 %v2105_v63  ;;  %v1047_v25 = vld [vmem:[%s3017_s3 + $0x18] sm:$0xff]  ;;  %v2221_v49 = vpack.c.bf16 %v1057_v44, %v1056_v43  ;;  %v2137_v7 = vpack.c.bf16 %v752_v4, %v751_v3  ;;  %v754_v9 = vld [vmem:[%s3016_s2 + $0x28] sm:$0xff]  ;;  %v755_v12 = vld [vmem:[%s3016_s2 + $0x30] sm:$0xff] }
  0x37   : > { %2086 = vmatprep.subr.bf16.mxu0 %v2085_v26  ;;  %2110 = vmatprep.subr.bf16.mxu1 %v2109_v2  ;;  %v2201_v26 = vpack.c.bf16 %v1047_v25, %v1046_v23  ;;  %v756_v13 = vld [vmem:[%s3016_s2 + $0x38] sm:$0xff]  ;;  %v757_v15 = vld [vmem:[%s3016_s2 + $0x40] sm:$0xff]  ;;  %v758_v16 = vld [vmem:[%s3016_s2 + $0x48] sm:$0xff] }
  0x38   : > { %v759_v18 = vld [vmem:[%s3016_s2 + $0x50] sm:$0xff]  ;;  %v760_v19 = vld [vmem:[%s3016_s2 + $0x58] sm:$0xff]  ;;  %v761_v21 = vld [vmem:[%s3016_s2 + $0x60] sm:$0xff] }
  0x39   : > { %v762_v22 = vld [vmem:[%s3016_s2 + $0x68] sm:$0xff]  ;;  %v764_v25 = vld [vmem:[%s3016_s2 + $0x78] sm:$0xff]  ;;  %v1518_v27 = vld [vmem:[%s3016_s2 + $0x100] sm:$0xff] }
  0x3a   : > { %2088 = vmatpush3.bf16.msra.mxu0 %v2087_v31  ;;  %2112 = vmatpush3.bf16.msra.mxu1 %v2109_v2  ;;  %v1051_v31 = vld [vmem:[%s3017_s3 + $0x38] sm:$0xff]  ;;  %v2157_v23 = vpack.c.bf16 %v762_v22, %v761_v21  ;;  %v1519_v28 = vld [vmem:[%s3016_s2 + $0x108] sm:$0xff]  ;;  %v1522_v35 = vld [vmem:[%s3016_s2 + $0x120] sm:$0xff] }
  0x3b   : > { %2090 = vmatprep.subr.bf16.mxu0 %v2089_v32  ;;  %2114 = vmatprep.subr.bf16.mxu1 %v2113_v5  ;;  %v2209_v32 = vpack.c.bf16 %v1051_v31, %v1050_v30  ;;  %v1520_v30 = vld [vmem:[%s3016_s2 + $0x110] sm:$0xff]  ;;  %v1521_v31 = vld [vmem:[%s3016_s2 + $0x118] sm:$0xff]  ;;  %v1526_v43 = vld [vmem:[%s3016_s2 + $0x140] sm:$0xff] }
  0x3c   : > { %v1527_v44 = vld [vmem:[%s3016_s2 + $0x148] sm:$0xff]  ;;  %v1566_v22 = vld [vmem:[%s3017_s3 + $0x170] sm:$0xff] }
  0x3e   : > { %2092 = vmatpush3.bf16.msra.mxu0 %v2091_v38  ;;  %2116 = vmatpush3.bf16.msra.mxu1 %v2113_v5  ;;  %v1055_v38 = vld [vmem:[%s3017_s3 + $0x58] sm:$0xff] }
  0x3f   : > { %2094 = vmatprep.subr.bf16.mxu0 %v2093_v40  ;;  %2118 = vmatprep.subr.bf16.mxu1 %v2117_v8  ;;  %v2217_v40 = vpack.c.bf16 %v1055_v38, %v1054_v37 }
  0x42   : > { %2096 = vmatpush3.bf16.msra.mxu0 %v2095_v45  ;;  %2120 = vmatpush3.bf16.msra.mxu1 %v2117_v8  ;;  %v753_v8 = vld [vmem:[%s3016_s2 + $0x20] sm:$0xff] }
  0x43   : > { %2098 = vmatprep.subr.bf16.mxu0 %v2097_v46  ;;  %2122 = vmatprep.subr.bf16.mxu1 %v2121_v11  ;;  %v2141_v10 = vpack.c.bf16 %v754_v9, %v753_v8  ;;  %v1558_v9 = vld [vmem:[%s3017_s3 + $0x130] sm:$0xff] }
  0x46   : > { %2100 = vmatpush3.bf16.msra.mxu0 %v2099_v51  ;;  %2124 = vmatpush3.bf16.msra.mxu1 %v2121_v11 }
  0x47   : > { %2126 = vmatprep.subr.bf16.mxu1 %v2125_v14  ;;  %2198 = vmatprep.subr.bf16.mxu0 %v2197_v24 }
  0x49   : > { %720 = vmatmul.mubr.f32.vlgmr.msra.gmra.mrb[4].mxu0 %v643_v56 }
  0x4a   : > { %724 = vmatprep.mubr.f32.mxu0 %v650_v58  ;;  %2128 = vmatpush3.bf16.msra.mxu1 %v2125_v14  ;;  %v2145_v14 = vpack.c.bf16 %v756_v13, %v755_v12  ;;  %v1560_v13 = vld [vmem:[%s3017_s3 + $0x140] sm:$0xff] }
  0x4b   : > { %2130 = vmatprep.subr.bf16.mxu1 %v2129_v17  ;;  %2200 = vmatpush3.bf16.msra.mxu0 %v2197_v24  ;;  %v763_v24 = vld [vmem:[%s3016_s2 + $0x70] sm:$0xff] }
  0x4c   : > { %2202 = vmatprep.subr.bf16.mxu0 %v2201_v26 }
  0x4d   : > { %725 = vmatmul.mubr.f32.gmra.mrb[6].mxu0 %v648_v59 }
  0x4e   : > { %2132 = vmatpush3.bf16.msra.mxu1 %v2129_v17  ;;  %v2149_v17 = vpack.c.bf16 %v758_v16, %v757_v15  ;;  %v1562_v16 = vld [vmem:[%s3017_s3 + $0x150] sm:$0xff] }
  0x4f   : > { %2134 = vmatprep.subr.bf16.mxu1 %v2752_v20  ;;  %2204 = vmatpush3.bf16.msra.mxu0 %v2201_v26  ;;  %v2161_v26 = vpack.c.bf16 %v764_v25, %v763_v24  ;;  %v1536_v25 = vld [vmem:[%s3017_s3 + $0x80] sm:$0xff] }
  0x50   : > { %2206 = vmatprep.subr.bf16.mxu0 %v2205_v29 }
  0x53   : > { %2208 = vmatpush3.bf16.msra.mxu0 %v2205_v29  ;;  %v2165_v29 = vpack.c.bf16 %v1519_v28, %v1518_v27  ;;  %v1538_v28 = vld [vmem:[%s3017_s3 + $0x90] sm:$0xff] }
  0x54   : > { %2210 = vmatprep.subr.bf16.mxu0 %v2209_v32 }
  0x57   : > { %2212 = vmatpush3.bf16.msra.mxu0 %v2209_v32  ;;  %v2169_v32 = vpack.c.bf16 %v1521_v31, %v1520_v30 }
  0x58   : > { %2214 = vmatprep.subr.bf16.mxu0 %v2213_v36 }
  0x5b   : > { %2216 = vmatpush3.bf16.msra.mxu0 %v2213_v36  ;;  %v1523_v36 = vld [vmem:[%s3016_s2 + $0x128] sm:$0xff] }
  0x5c   : > { %2218 = vmatprep.subr.bf16.mxu0 %v2217_v40  ;;  %v2173_v38 = vpack.c.bf16 %v1523_v36, %v1522_v35  ;;  %v1542_v36 = vld [vmem:[%s3017_s3 + $0xb0] sm:$0xff] }
  0x5f   : > { %2220 = vmatpush3.bf16.msra.mxu0 %v2217_v40  ;;  %v1524_v40 = vld [vmem:[%s3016_s2 + $0x130] sm:$0xff] }
  0x60   : > { %2222 = vmatprep.subr.bf16.mxu0 %v2221_v49 }
  0x63   : > { %2224 = vmatpush3.bf16.msra.mxu0 %v2221_v49  ;;  %v1530_v49 = vld [vmem:[%s3016_s2 + $0x160] sm:$0xff] }
  0xfc   : > { %v1605_v41 = vpop.f32.mrb[0].mxu0 }
  0xfd   : > { %v1643_v42 = vpop.f32.mrb[0].mxu1  ;;  %v1606_v45 = vpop.f32.mrb[1].mxu0 }
  0xfe   : > { %v1644_v46 = vpop.f32.mrb[1].mxu1  ;;  %v1607_v47 = vadd.f32 %v1606_v45, %v1605_v41  ;;  %v1525_v41 = vld [vmem:[%s3016_s2 + $0x138] sm:$0xff]  ;;  %v2181_v45 = vpack.c.bf16 %v1527_v44, %v1526_v43  ;;  %v1546_v43 = vld [vmem:[%s3017_s3 + $0xd0] sm:$0xff] }
  0xff   : > { %v1645_v48 = vadd.f32 %v1644_v46, %v1643_v42  ;;  %v2177_v42 = vpack.c.bf16 %v1525_v41, %v1524_v40  ;;  %v1528_v46 = vld [vmem:[%s3016_s2 + $0x150] sm:$0xff]  ;;  %v1544_v40 = vld [vmem:[%s3017_s3 + $0xc0] sm:$0xff]  ;;  %v1545_v41 = vld [vmem:[%s3017_s3 + $0xc8] sm:$0xff] }
 0x100   : > { %v1608_v51 = vpop.f32.mrb[2].mxu0  ;;  %v1547_v44 = vld [vmem:[%s3017_s3 + $0xd8] sm:$0xff] }
 0x101   : > { %v591_v50 = vadd.f32 %v1645_v48, %v1607_v47  ;;  %v1646_v52 = vpop.f32.mrb[2].mxu1  ;;  %v1609_v53 = vpop.f32.mrb[3].mxu0  ;;  %v1529_v47 = vld [vmem:[%s3016_s2 + $0x158] sm:$0xff] }
 0x102   : > { %v1647_v54 = vpop.f32.mrb[3].mxu1  ;;  %v1610_v55 = vadd.f32 %v1609_v53, %v1608_v51  ;;  %v2185_v48 = vpack.c.bf16 %v1529_v47, %v1528_v46  ;;  %v1533_v53 = vld [vmem:[%s3016_s2 + $0x178] sm:$0xff]  ;;  %v1548_v46 = vld [vmem:[%s3017_s3 + $0xe0] sm:$0xff]  ;;  %v1549_v47 = vld [vmem:[%s3017_s3 + $0xe8] sm:$0xff] }
 0x103   : > { %v1648_v56 = vadd.f32 %v1647_v54, %v1646_v52  ;;  %v1532_v52 = vld [vmem:[%s3016_s2 + $0x170] sm:$0xff] }
 0x104   : > { %v2193_v54 = vpack.c.bf16 %v1533_v53, %v1532_v52  ;;  %v1535_v52 = vld [vmem:[%s3020_s6] ss:$0 sm:$0xff] }
 0x105   : > { %v596_v57 = vadd.f32 %v1648_v56, %v1610_v55  ;;  %v1058_v56 = vld [vmem:[%s3017_s3 + $0x70] sm:$0xff] }
 0x11c   : > { %v1681_v58 = vpop.f32.mrb[4].mxu0 }
 0x11d   : > { %v1682_v59 = vpop.f32.mrb[5].mxu0 }
 0x11e   : > { %v1683_v39 = vadd.f32 %v1682_v59, %v1681_v58  ;;  %v1552_v59 = vld [vmem:[%s3017_s3 + $0x100] sm:$0xff] }
 0x120   : > { %v730_v61 = vadd.f32 %v1683_v39, %v591_v50  ;;  %v1684_v33 = vpop.f32.mrb[6].mxu0  ;;  %v1531_v50 = vld [vmem:[%s3016_s2 + $0x168] sm:$0xff] }
 0x121   : > { %v1685_v62 = vpop.f32.mrb[7].mxu0  ;;  %v2189_v51 = vpack.c.bf16 %v1531_v50, %v1530_v49  ;;  %v1553_v39 = vld [vmem:[%s3017_s3 + $0x108] sm:$0xff]  ;;  %v1550_v49 = vld [vmem:[%s3017_s3 + $0xf0] sm:$0xff]  ;;  %v1551_v50 = vld [vmem:[%s3017_s3 + $0xf8] sm:$0xff] }
 0x122   : > { %v739_v63 = vadd.f32 %v1501_v60, %v730_v61  ;;  %v1686_v0 = vadd.f32 %v1685_v62, %v1684_v33  ;;  %v1534_v61 = vld [vmem:[%s3019_s5] ss:$0 sm:$0xff] }
 0x124   : > { %v741_v1 = vmax.f32 %v739_v63, 0.0  ;;  %v731_v2 = vadd.f32 %v1686_v0, %v596_v57  ;;  %v1059_v57 = vld [vmem:[%s3017_s3 + $0x78] sm:$0xff] }
 0x125   : > { %v2225_v58 = vpack.c.bf16 %v1059_v57, %v1058_v56 }
 0x126   : > { %745 = vst [vmem:[#allocation3 + $0x1] sm:$0xff] %v741_v1  ;;  %v740_v5 = vadd.f32 %v1501_v60, %v731_v2  ;;  %1827 = vmatprep.mubr.f32.mxu1 %v741_v1  ;;  %v2229_v60 = vpack.c.bf16 %v1553_v39, %v1552_v59  ;;  %v1554_v1 = vld [vmem:[%s3017_s3 + $0x110] sm:$0xff]  ;;  %v1555_v2 = vld [vmem:[%s3017_s3 + $0x118] sm:$0xff] }
 0x127   : > { %2226 = vmatprep.subr.bf16.mxu0 %v2225_v58 }
 0x128   : > { %v742_v6 = vmax.f32 %v740_v5, 0.0  ;;  %2228 = vmatpush3.bf16.msra.mxu0 %v2225_v58  ;;  %v2233_v5 = vpack.c.bf16 %v1555_v2, %v1554_v1 }
 0x129   : > { %2230 = vmatprep.subr.bf16.mxu0 %v2229_v60 }
 0x12a   : > { %746 = vst [vmem:[#allocation3 + $0x9] sm:$0xff] %v742_v6  ;;  %1828 = vmatmul.mubr.f32.vlgmr.msra.gmra.mrb[4].mxu1 %v742_v6  ;;  %v1556_v6 = vld [vmem:[%s3017_s3 + $0x120] sm:$0xff] }
 0x12b   : > { %2136 = vmatpush3.bf16.msra.mxu1 %v2752_v20  ;;  %v2153_v20 = vpack.c.bf16 %v760_v19, %v759_v18  ;;  %v1564_v19 = vld [vmem:[%s3017_s3 + $0x160] sm:$0xff] }
 0x12c   : > { %2138 = vmatprep.subr.bf16.mxu1 %v2137_v7 }
 0x12d   : > { %v747_v11 = vld [vmem:[#allocation3] sm:$0xff] }
 0x12e   : > { %1862 = vmatprep.mubr.f32.mxu1 %v747_v11 }
 0x12f   : > { %2140 = vmatpush3.bf16.msra.mxu1 %v2137_v7  ;;  %v1557_v7 = vld [vmem:[%s3017_s3 + $0x128] sm:$0xff] }
 0x130   : > { %2142 = vmatprep.subr.bf16.mxu1 %v2141_v10  ;;  %v2237_v8 = vpack.c.bf16 %v1557_v7, %v1556_v6 }
 0x131   : > { %v748_v34 = vld [vmem:[#allocation3 + $0x8] sm:$0xff] }
 0x132   : > { %v934_v37 = vld [vmem:[#allocation3 + $0x2] sm:$0xff]  ;;  %v935_v55 = vld [vmem:[#allocation3 + $0xa] sm:$0xff] }
 0x133   : > { %2144 = vmatpush3.bf16.msra.mxu1 %v2141_v10  ;;  %v1559_v10 = vld [vmem:[%s3017_s3 + $0x138] sm:$0xff] }
 0x134   : > { %2146 = vmatprep.subr.bf16.mxu1 %v2145_v14  ;;  %v2241_v12 = vpack.c.bf16 %v1559_v10, %v1558_v9 }
 0x137   : > { %2148 = vmatpush3.bf16.msra.mxu1 %v2145_v14  ;;  %v1561_v14 = vld [vmem:[%s3017_s3 + $0x148] sm:$0xff] }
 0x138   : > { %2150 = vmatprep.subr.bf16.mxu1 %v2149_v17  ;;  %v2245_v15 = vpack.c.bf16 %v1561_v14, %v1560_v13 }
 0x13b   : > { %2152 = vmatpush3.bf16.msra.mxu1 %v2149_v17  ;;  %v1563_v17 = vld [vmem:[%s3017_s3 + $0x158] sm:$0xff] }
 0x13c   : > { %2154 = vmatprep.subr.bf16.mxu1 %v2153_v20  ;;  %v2249_v18 = vpack.c.bf16 %v1563_v17, %v1562_v16 }
 0x13f   : > { %2156 = vmatpush3.bf16.msra.mxu1 %v2153_v20  ;;  %v1565_v20 = vld [vmem:[%s3017_s3 + $0x168] sm:$0xff] }
 0x140   : > { %2158 = vmatprep.subr.bf16.mxu1 %v2157_v23  ;;  %v2253_v21 = vpack.c.bf16 %v1565_v20, %v1564_v19 }
 0x143   : > { %2160 = vmatpush3.bf16.msra.mxu1 %v2157_v23  ;;  %v1567_v23 = vld [vmem:[%s3017_s3 + $0x178] sm:$0xff] }
 0x144   : > { %2162 = vmatprep.subr.bf16.mxu1 %v2161_v26  ;;  %v2257_v24 = vpack.c.bf16 %v1567_v23, %v1566_v22 }
 0x147   : > { %2164 = vmatpush3.bf16.msra.mxu1 %v2161_v26  ;;  %v1537_v26 = vld [vmem:[%s3017_s3 + $0x88] sm:$0xff] }
 0x148   : > { %2166 = vmatprep.subr.bf16.mxu1 %v2165_v29  ;;  %v2261_v27 = vpack.c.bf16 %v1537_v26, %v1536_v25 }
 0x14a   : > { %1863 = vmatmul.mubr.f32.vlgmr.msra.gmra.mrb[4].mxu1 %v748_v34  ;;  %v1541_v34 = vld [vmem:[%s3017_s3 + $0xa8] sm:$0xff] }
 0x14b   : > { %2168 = vmatpush3.bf16.msra.mxu1 %v2165_v29  ;;  %1897 = vmatprep.mubr.f32.mxu1 %v934_v37  ;;  %v1539_v29 = vld [vmem:[%s3017_s3 + $0x98] sm:$0xff] }
 0x14c   : > { %2170 = vmatprep.subr.bf16.mxu1 %v2169_v32  ;;  %v2265_v30 = vpack.c.bf16 %v1539_v29, %v1538_v28  ;;  %v1543_v37 = vld [vmem:[%s3017_s3 + $0xb8] sm:$0xff] }
 0x14f   : > { %2172 = vmatpush3.bf16.msra.mxu1 %v2169_v32  ;;  %v1540_v32 = vld [vmem:[%s3017_s3 + $0xa0] sm:$0xff] }
 0x150   : > { %2174 = vmatprep.subr.bf16.mxu1 %v2173_v38  ;;  %v2269_v35 = vpack.c.bf16 %v1541_v34, %v1540_v32 }
 0x153   : > { %2176 = vmatpush3.bf16.msra.mxu1 %v2173_v38  ;;  %v2273_v38 = vpack.c.bf16 %v1543_v37, %v1542_v36 }
 0x154   : > { %2178 = vmatprep.subr.bf16.mxu1 %v2177_v42 }
 0x157   : > { %2180 = vmatpush3.bf16.msra.mxu1 %v2177_v42  ;;  %v2277_v42 = vpack.c.bf16 %v1545_v41, %v1544_v40 }
 0x158   : > { %2182 = vmatprep.subr.bf16.mxu1 %v2181_v45 }
 0x15b   : > { %2184 = vmatpush3.bf16.msra.mxu1 %v2181_v45  ;;  %v2281_v45 = vpack.c.bf16 %v1547_v44, %v1546_v43 }
 0x15c   : > { %2186 = vmatprep.subr.bf16.mxu1 %v2185_v48 }
 0x15f   : > { %2188 = vmatpush3.bf16.msra.mxu1 %v2185_v48  ;;  %v2285_v48 = vpack.c.bf16 %v1549_v47, %v1548_v46 }
 0x160   : > { %2190 = vmatprep.subr.bf16.mxu1 %v2189_v51 }
 0x163   : > { %2192 = vmatpush3.bf16.msra.mxu1 %v2189_v51  ;;  %v2289_v51 = vpack.c.bf16 %v1551_v50, %v1550_v49 }
 0x164   : > { %2194 = vmatprep.subr.bf16.mxu1 %v2193_v54 }
 0x167   : > { %2196 = vmatpush3.bf16.msra.mxu1 %v2193_v54 }
 0x16a   : > { %1898 = vmatmul.mubr.f32.vlgmr.msra.gmra.mrb[4].mxu1 %v935_v55 }
 0x23d   : > { %v1899_v33 = vpop.f32.mrb[4].mxu1 }
 0x23e   : > { %v1038_v62 = vadd.f32 %v1899_v33, %v1534_v61  ;;  %v1019_v63 = vpop.f32.mrb[5].mxu1 }
 0x23f   : > { %v1037_v0 = vadd.f32 %v1534_v61, %v1019_v63 }
 0x240   : > { %v2912_v3 = vmax.f32 %v1038_v62, 0.0 }
 0x241   : > { %v1039_v4 = vmax.f32 %v1037_v0, 0.0 }
 0x242   : > { %1042 = vst [vmem:[#allocation4 + $0x8] sm:$0xff] %v2912_v3 }
 0x243   : > { %1041 = vst [vmem:[#allocation4] sm:$0xff] %v1039_v4  ;;  %1932 = vmatprep.mubr.f32.mxu0 %v1039_v4 }
 0x244   : > { %1933 = vmatmul.mubr.f32.vlgmr.msra.gmra.mrb[8].mxu0 %v2912_v3 }
 0x245   : > { %2232 = vmatpush3.bf16.msra.mxu0 %v2229_v60 }
 0x246   : > { %2234 = vmatprep.subr.bf16.mxu0 %v2233_v5 }
 0x249   : > { %2236 = vmatpush3.bf16.msra.mxu0 %v2233_v5  ;;  %v1162_v31 = vld [vmem:[#allocation4 + $0x9] sm:$0xff] }
 0x24a   : > { %2238 = vmatprep.subr.bf16.mxu0 %v2237_v8  ;;  %v1161_v11 = vld [vmem:[#allocation4 + $0x1] sm:$0xff] }
 0x24b   : > { %1967 = vmatprep.mubr.f32.mxu0 %v1161_v11 }
 0x24d   : > { %2240 = vmatpush3.bf16.msra.mxu0 %v2237_v8 }
 0x24e   : > { %2242 = vmatprep.subr.bf16.mxu0 %v2241_v12 }
 0x251   : > { %2244 = vmatpush3.bf16.msra.mxu0 %v2241_v12 }
 0x252   : > { %2246 = vmatprep.subr.bf16.mxu0 %v2245_v15 }
 0x255   : > { %2248 = vmatpush3.bf16.msra.mxu0 %v2245_v15 }
 0x256   : > { %2250 = vmatprep.subr.bf16.mxu0 %v2249_v18 }
 0x259   : > { %2252 = vmatpush3.bf16.msra.mxu0 %v2249_v18 }
 0x25a   : > { %2254 = vmatprep.subr.bf16.mxu0 %v2253_v21 }
 0x25d   : > { %2256 = vmatpush3.bf16.msra.mxu0 %v2253_v21 }
 0x25e   : > { %2258 = vmatprep.subr.bf16.mxu0 %v2257_v24 }
 0x261   : > { %2260 = vmatpush3.bf16.msra.mxu0 %v2257_v24 }
 0x262   : > { %2262 = vmatprep.subr.bf16.mxu0 %v2261_v27 }
 0x264   : > { %1968 = vmatmul.mubr.f32.vlgmr.msra.gmra.mrb[10].mxu0 %v1162_v31 }
 0x265   : > { %2264 = vmatpush3.bf16.msra.mxu0 %v2261_v27  ;;  %2002 = vmatprep.mubr.f32.mxu0 %v1039_v4 }
 0x266   : > { %2266 = vmatprep.subr.bf16.mxu0 %v2265_v30 }
 0x269   : > { %2268 = vmatpush3.bf16.msra.mxu0 %v2265_v30 }
 0x26a   : > { %2270 = vmatprep.subr.bf16.mxu0 %v2269_v35 }
 0x26d   : > { %2272 = vmatpush3.bf16.msra.mxu0 %v2269_v35 }
 0x26e   : > { %2274 = vmatprep.subr.bf16.mxu0 %v2273_v38 }
 0x271   : > { %2276 = vmatpush3.bf16.msra.mxu0 %v2273_v38 }
 0x272   : > { %2278 = vmatprep.subr.bf16.mxu0 %v2277_v42 }
 0x275   : > { %2280 = vmatpush3.bf16.msra.mxu0 %v2277_v42 }
 0x276   : > { %2282 = vmatprep.subr.bf16.mxu0 %v2281_v45 }
 0x279   : > { %2284 = vmatpush3.bf16.msra.mxu0 %v2281_v45 }
 0x27a   : > { %2286 = vmatprep.subr.bf16.mxu0 %v2285_v48 }
 0x27d   : > { %2288 = vmatpush3.bf16.msra.mxu0 %v2285_v48 }
 0x27e   : > { %2290 = vmatprep.subr.bf16.mxu0 %v2289_v51 }
 0x281   : > { %2292 = vmatpush3.bf16.msra.mxu0 %v2289_v51 }
 0x284   : > { %2003 = vmatmul.mubr.f32.vlgmr.msra.gmra.mrb[10].mxu0 %v2912_v3 }
 0x317   : > { %v1934_v53 = vpop.f32.mrb[8].mxu0 }
 0x318   : > { %v1139_v54 = vadd.f32 %v1934_v53, %v1535_v52  ;;  %v1133_v55 = vpop.f32.mrb[9].mxu0 }
 0x319   : > { %v1134_v56 = vadd.f32 %v1535_v52, %v1133_v55 }
 0x31a   : > { %v1143_v57 = vmax.f32 %v1139_v54, 0.0 }
 0x31b   : > { %v1142_v58 = vmax.f32 %v1134_v56, 0.0 }
 0x31c   : > { %1335 = vst [vmem:[%s313_s26 + $0x8] sm:$0xff] %v1143_v57 }
 0x31d   : > { %1334 = vst [vmem:[%s313_s26] sm:$0xff] %v1142_v58 }
 0x357   : > { %v2004_v59 = vpop.f32.mrb[10].mxu0 }
 0x358   : > { %v1331_v39 = vadd.f32 %v2004_v59, %v1535_v52  ;;  %v1321_v60 = vpop.f32.mrb[11].mxu0 }
 0x359   : > { %v1330_v61 = vadd.f32 %v1535_v52, %v1321_v60 }
 0x35a   : > { %v1333_v33 = vmax.f32 %v1331_v39, 0.0 }
 0x35b   : > { %v1332_v62 = vmax.f32 %v1330_v61, 0.0 }
 0x35c   : > { %1337 = vst [vmem:[%s318_s30 + $0x8] sm:$0xff] %v1333_v33 }
 0x35d   : > { %1336 = vst [vmem:[%s318_s30] sm:$0xff] %v1332_v62 }
 0x35e PF: > { %s19_s27 = sadd.s32 1, %s2314_s27  }
 0x35f   : > { %p16_p4 = scmp.ge.s32.totalorder %s19_s27, 4  }
 0x361   :  { %18 = sbr.rel (!%p16_p4) target bundleno = 1 (0x1), region = 97 }

</bundles_post_ra>
